<compile_context>
chip_gen: v5e
topology: v5e:2x2
jax: 0.10.0
libtpu: 0.0.40
codegen_flags: <defaults>
</compile_context>

<pallas_src>
import jax
import jax.numpy as jnp
from jax.experimental import pallas as pl
from jax.experimental.pallas import tpu as pltpu

EMB_CHAR = 50          # fixed by the module (self.emb_char = 50)
KERNEL_SIZE = 5        # CNN kernel size used in the a5 assignment
CONV_PAD = 1           # Conv1d padding used in the a5 assignment


def _round_up(x, m):
    return ((x + m - 1) // m) * m


def char_cnn_highway_kernel(ids_ref, emb_ref, wconv_ref, bconv_ref,
                            whw_ref, bhw_ref, o_ref, xw_ref):
    """One tile of `tm` words.

    ids_ref:   (tm, W)        int32 char indices
    emb_ref:   (V, C)         bf16 char embedding table (VMEM resident)
    wconv_ref: (K*C, E)       bf16 conv weights, tap-major / channel-minor
    bconv_ref: (1, E)         f32 conv bias
    whw_ref:   (E, 2E)        bf16 fused highway weights [proj | gate]
    bhw_ref:   (1, 2E)        f32 fused highway bias     [proj | gate]
    o_ref:     (tm, E)        f32 word embeddings
    xw_ref:    (tm, (W+2p)*C) bf16 scratch: zero-padded char embeddings,
                              laid out contiguously along lanes (im2col strip)
    """
    tm, w_len = ids_ref.shape
    v, c = emb_ref.shape
    kc = wconv_ref.shape[0]
    e = bconv_ref.shape[1]
    k = kc // c
    l_out = w_len + 2 * CONV_PAD - k + 1
    pad_w = CONV_PAD * c

    emb = emb_ref[...]                                            # (V, C) bf16
    iota_v = jax.lax.broadcasted_iota(jnp.int32, (tm, v), 1)

    # Zero the left/right padding bands of the im2col strip.
    zeros_band = jnp.zeros((tm, pad_w), jnp.bfloat16)
    xw_ref[:, 0:pad_w] = zeros_band
    xw_ref[:, pad_w + w_len * c:] = zeros_band

    # Char-embedding gather via one-hot matmul (MXU), one char position per dot.
    for wi in range(w_len):                                       # static, W=12
        ids_w = ids_ref[:, wi:wi + 1]                             # (tm, 1) int32
        onehot = (ids_w == iota_v).astype(jnp.bfloat16)           # (tm, V)
        x_w = jnp.dot(onehot, emb, preferred_element_type=jnp.float32)
        xw_ref[:, pad_w + wi * c: pad_w + (wi + 1) * c] = x_w.astype(jnp.bfloat16)

    # Conv1d as im2col matmuls (contraction K*C = 250) fused with running max.
    wc = wconv_ref[...]                                           # (K*C, E) bf16
    mx = None
    for l in range(l_out):                                        # static, L=10
        window = xw_ref[:, l * c: l * c + kc]                     # (tm, K*C) bf16
        z = jnp.dot(window, wc, preferred_element_type=jnp.float32)
        mx = z if mx is None else jnp.maximum(mx, z)
    # bias is constant over time, so add after the max; ReLU commutes with max.
    pooled = jnp.maximum(mx + bconv_ref[...], 0.0)                # (tm, E) f32

    # Fused highway: [proj | gate] in one matmul.
    hz = jnp.dot(pooled.astype(jnp.bfloat16), whw_ref[...],
                 preferred_element_type=jnp.float32) + bhw_ref[...]   # (tm, 2E)
    proj = jnp.maximum(hz[:, :e], 0.0)
    gate = jax.nn.sigmoid(hz[:, e:])
    highway = gate * proj + (1.0 - gate) * pooled

    # Dropout (eval mode) = identity.
    o_ref[...] = highway.astype(o_ref.dtype)


def model_embeddings_forward(input_ids, params, *, tm=256):
    """input_ids: (sent_len, batch, max_word) int32 char indices.

    Returns (sent_len, batch, word_embed_size) float32.
    """
    char_emb = params['char_emb'].astype(jnp.bfloat16)            # (V, C)
    wconv = params['wconv']                                       # (K, C, E)
    k, c, e = wconv.shape
    wconv_flat = wconv.reshape(k * c, e).astype(jnp.bfloat16)     # (K*C, E)
    bconv = params['bconv'].astype(jnp.float32)                   # (1, E)
    whw = jnp.concatenate([params['wproj'], params['wgate']],
                          axis=1).astype(jnp.bfloat16)            # (E, 2E)
    bhw = jnp.concatenate([params['bproj'], params['bgate']],
                          axis=1).astype(jnp.float32)             # (1, 2E)

    sent_len, batch, max_word = input_ids.shape
    n = sent_len * batch
    ids = input_ids.reshape(n, max_word).astype(jnp.int32)

    # Pick a sublane-aligned word tile and pad N up to a multiple of it.
    tm = _round_up(max(8, min(tm, n)), 8)
    n_pad = _round_up(n, tm)
    if n_pad != n:
        ids = jnp.pad(ids, ((0, n_pad - n), (0, 0)))              # pad ids = 0

    strip_w = (max_word + 2 * CONV_PAD) * c
    grid = (n_pad // tm,)

    out = pl.pallas_call(
        char_cnn_highway_kernel,
        out_shape=jax.ShapeDtypeStruct((n_pad, e), jnp.float32),
        grid_spec=pltpu.PrefetchScalarGridSpec(
            num_scalar_prefetch=0,
            grid=grid,
            in_specs=[
                pl.BlockSpec((tm, max_word), lambda i: (i, 0)),     # char ids
                pl.BlockSpec(char_emb.shape, lambda i: (0, 0)),     # emb table
                pl.BlockSpec((k * c, e), lambda i: (0, 0)),         # conv W
                pl.BlockSpec((1, e), lambda i: (0, 0)),             # conv b
                pl.BlockSpec((e, 2 * e), lambda i: (0, 0)),         # highway W
                pl.BlockSpec((1, 2 * e), lambda i: (0, 0)),         # highway b
            ],
            out_specs=pl.BlockSpec((tm, e), lambda i: (i, 0)),
            scratch_shapes=[pltpu.VMEM((tm, strip_w), jnp.bfloat16)],
        ),
        compiler_params=pltpu.CompilerParams(
            dimension_semantics=("parallel",)),
    )(ids, char_emb, wconv_flat, bconv, whw, bhw)

    return out[:n].reshape(sent_len, batch, e)


def reference_forward(input_ids, params):
    """Pure-JAX reference with the same math/dtypes, for correctness checking."""
    char_emb = params['char_emb'].astype(jnp.bfloat16)
    wconv = params['wconv'].astype(jnp.bfloat16)
    bconv = params['bconv'].astype(jnp.float32)
    wproj = params['wproj'].astype(jnp.bfloat16)
    bproj = params['bproj'].astype(jnp.float32)
    wgate = params['wgate'].astype(jnp.bfloat16)
    bgate = params['bgate'].astype(jnp.float32)

    sent_len, batch, max_word = input_ids.shape
    c = char_emb.shape[1]
    e = wconv.shape[2]
    n = sent_len * batch

    x = char_emb[input_ids.reshape(n, max_word)]                  # (N, W, C) bf16
    x = jnp.pad(x, ((0, 0), (CONV_PAD, CONV_PAD), (0, 0)))
    l_out = max_word + 2 * CONV_PAD - KERNEL_SIZE + 1

    acc = jnp.zeros((n, l_out, e), jnp.float32)
    for t in range(KERNEL_SIZE):
        acc = acc + jnp.einsum('nlc,co->nlo', x[:, t:t + l_out, :], wconv[t],
                               preferred_element_type=jnp.float32)
    conv = acc + bconv.reshape(1, 1, e)
    pooled = jnp.maximum(jnp.max(conv, axis=1), 0.0)
    pooled_b = pooled.astype(jnp.bfloat16)
    proj = jnp.maximum(
        jnp.dot(pooled_b, wproj, preferred_element_type=jnp.float32) + bproj, 0.0)
    gate = jax.nn.sigmoid(
        jnp.dot(pooled_b, wgate, preferred_element_type=jnp.float32) + bgate)
    hwy = gate * proj + (1.0 - gate) * pooled
    return hwy.reshape(sent_len, batch, e)


def init_params(key, *, vocab_char=96, word_embed_size=32, pad_idx=0):
    k0, k1, k2, k3 = jax.random.split(key, 4)
    char_emb = 0.1 * jax.random.normal(k0, (vocab_char, EMB_CHAR), jnp.float32)
    char_emb = char_emb.at[pad_idx].set(0.0)   # nn.Embedding padding_idx
    wconv = 0.1 * jax.random.normal(
        k1, (KERNEL_SIZE, EMB_CHAR, word_embed_size), jnp.float32)
    bconv = jnp.zeros((1, word_embed_size), jnp.float32)
    wproj = 0.1 * jax.random.normal(
        k2, (word_embed_size, word_embed_size), jnp.float32)
    bproj = jnp.zeros((1, word_embed_size), jnp.float32)
    wgate = 0.1 * jax.random.normal(
        k3, (word_embed_size, word_embed_size), jnp.float32)
    bgate = jnp.zeros((1, word_embed_size), jnp.float32)
    # NOTE: wproj/wgate stored as (in, out), i.e. transposed vs nn.Linear.
    return dict(char_emb=char_emb, wconv=wconv, bconv=bconv,
                wproj=wproj, bproj=bproj, wgate=wgate, bgate=bgate)


if __name__ == "__main__":
    key = jax.random.PRNGKey(0)
    k_param, k_ids = jax.random.split(key)

    sent_len, batch, max_word = 8, 2, 12
    word_embed_size = 32
    vocab_char = 96

    params = init_params(k_param, vocab_char=vocab_char,
                         word_embed_size=word_embed_size, pad_idx=0)
    input_ids = jax.random.randint(
        k_ids, (sent_len, batch, max_word), 0, vocab_char, dtype=jnp.int32)

    out = model_embeddings_forward(input_ids, params, tm=256)
    out = jax.block_until_ready(out)

    ref = reference_forward(input_ids, params)
    assert out.shape == (sent_len, batch, word_embed_size)
    assert jnp.allclose(out, ref, atol=1e-2, rtol=1e-2), "mismatch vs reference"

    print("KERNEL_OK")
</pallas_src>

<mosaic_0001>
module attributes {stable_mosaic.version = 11 : i64} {
  func.func @char_cnn_highway_kernel(%arg0: i32, %arg1: memref<16x12xi32, #tpu.memory_space<vmem>>, %arg2: memref<96x50xbf16, #tpu.memory_space<vmem>>, %arg3: memref<250x32xbf16, #tpu.memory_space<vmem>>, %arg4: memref<1x32xf32, #tpu.memory_space<vmem>>, %arg5: memref<32x64xbf16, #tpu.memory_space<vmem>>, %arg6: memref<1x64xf32, #tpu.memory_space<vmem>>, %arg7: memref<16x32xf32, #tpu.memory_space<vmem>>, %arg8: memref<16x700xbf16, #tpu.memory_space<vmem>>) attributes {dimension_semantics = [#tpu.dimension_semantics<parallel>], iteration_bounds = array<i64: 1>, scalar_prefetch = 0 : i64, scratch_operands = 1 : i64, tpu.core_type = #tpu.core_type<tc>, window_params = [{transform_indices = @transform_0, window_bounds = array<i64: 16, 12>}, {pipeline_mode = #tpu.pipeline_mode<synchronous>, transform_indices = @transform_1, window_bounds = array<i64: 96, 50>}, {pipeline_mode = #tpu.pipeline_mode<synchronous>, transform_indices = @transform_2, window_bounds = array<i64: 250, 32>}, {pipeline_mode = #tpu.pipeline_mode<synchronous>, transform_indices = @transform_3, window_bounds = array<i64: 1, 32>}, {pipeline_mode = #tpu.pipeline_mode<synchronous>, transform_indices = @transform_4, window_bounds = array<i64: 32, 64>}, {pipeline_mode = #tpu.pipeline_mode<synchronous>, transform_indices = @transform_5, window_bounds = array<i64: 1, 64>}, {transform_indices = @transform_6, window_bounds = array<i64: 16, 32>}]} {
    %c0 = arith.constant 0 : index
    %c0_0 = arith.constant 0 : index
    %0 = vector.load %arg2[%c0, %c0_0] : memref<96x50xbf16, #tpu.memory_space<vmem>>, vector<96x50xbf16>
    %1 = tpu.iota {dimensions = array<i32: 1>} : vector<16x96xi32>
    %cst = arith.constant 0.000000e+00 : bf16
    %2 = vector.broadcast %cst : bf16 to vector<16x50xbf16>
    %c0_1 = arith.constant 0 : index
    %c0_2 = arith.constant 0 : index
    %3 = vector.load %arg8[%c0_1, %c0_2] : memref<16x700xbf16, #tpu.memory_space<vmem>>, vector<16x50xbf16>
    tpu.vector_store %arg8[%c0_1, %c0_2], %2 {strides = array<i32>} : memref<16x700xbf16, #tpu.memory_space<vmem>>, vector<16x50xbf16>,
    %c0_3 = arith.constant 0 : index
    %c650 = arith.constant 650 : index
    %4 = vector.load %arg8[%c0_3, %c650] : memref<16x700xbf16, #tpu.memory_space<vmem>>, vector<16x50xbf16>
    tpu.vector_store %arg8[%c0_3, %c650], %2 {strides = array<i32>} : memref<16x700xbf16, #tpu.memory_space<vmem>>, vector<16x50xbf16>,
    %c0_4 = arith.constant 0 : index
    %c0_5 = arith.constant 0 : index
    %5 = vector.load %arg1[%c0_4, %c0_5] : memref<16x12xi32, #tpu.memory_space<vmem>>, vector<16x1xi32>
    %6 = vector.broadcast %5 : vector<16x1xi32> to vector<16x96xi32>
    %7 = arith.cmpi eq, %6, %1 : vector<16x96xi32>
    %8 = arith.extui %7 : vector<16x96xi1> to vector<16x96xi32>
    %9 = arith.sitofp %8 : vector<16x96xi32> to vector<16x96xf32>
    %10 = arith.truncf %9 : vector<16x96xf32> to vector<16x96xbf16>
    %cst_6 = arith.constant dense<0.000000e+00> : vector<16x50xf32>
    %11 = tpu.matmul %10, %0, %cst_6 {dimension_numbers = #tpu.dot_dimension_numbers<[1], [0], [0], [1], [0, 0, 1, 1], [], []>} : vector<16x96xbf16>, vector<96x50xbf16>, vector<16x50xf32> -> vector<16x50xf32>
    %12 = arith.truncf %11 : vector<16x50xf32> to vector<16x50xbf16>
    %c0_7 = arith.constant 0 : index
    %c50 = arith.constant 50 : index
    %13 = vector.load %arg8[%c0_7, %c50] : memref<16x700xbf16, #tpu.memory_space<vmem>>, vector<16x50xbf16>
    tpu.vector_store %arg8[%c0_7, %c50], %12 {strides = array<i32>} : memref<16x700xbf16, #tpu.memory_space<vmem>>, vector<16x50xbf16>,
    %c0_8 = arith.constant 0 : index
    %c1 = arith.constant 1 : index
    %14 = vector.load %arg1[%c0_8, %c1] : memref<16x12xi32, #tpu.memory_space<vmem>>, vector<16x1xi32>
    %15 = vector.broadcast %14 : vector<16x1xi32> to vector<16x96xi32>
    %16 = arith.cmpi eq, %15, %1 : vector<16x96xi32>
    %17 = arith.extui %16 : vector<16x96xi1> to vector<16x96xi32>
    %18 = arith.sitofp %17 : vector<16x96xi32> to vector<16x96xf32>
    %19 = arith.truncf %18 : vector<16x96xf32> to vector<16x96xbf16>
    %cst_9 = arith.constant dense<0.000000e+00> : vector<16x50xf32>
    %20 = tpu.matmul %19, %0, %cst_9 {dimension_numbers = #tpu.dot_dimension_numbers<[1], [0], [0], [1], [0, 0, 1, 1], [], []>} : vector<16x96xbf16>, vector<96x50xbf16>, vector<16x50xf32> -> vector<16x50xf32>
    %21 = arith.truncf %20 : vector<16x50xf32> to vector<16x50xbf16>
    %c0_10 = arith.constant 0 : index
    %c100 = arith.constant 100 : index
    %22 = vector.load %arg8[%c0_10, %c100] : memref<16x700xbf16, #tpu.memory_space<vmem>>, vector<16x50xbf16>
    tpu.vector_store %arg8[%c0_10, %c100], %21 {strides = array<i32>} : memref<16x700xbf16, #tpu.memory_space<vmem>>, vector<16x50xbf16>,
    %c0_11 = arith.constant 0 : index
    %c2 = arith.constant 2 : index
    %23 = vector.load %arg1[%c0_11, %c2] : memref<16x12xi32, #tpu.memory_space<vmem>>, vector<16x1xi32>
    %24 = vector.broadcast %23 : vector<16x1xi32> to vector<16x96xi32>
    %25 = arith.cmpi eq, %24, %1 : vector<16x96xi32>
    %26 = arith.extui %25 : vector<16x96xi1> to vector<16x96xi32>
    %27 = arith.sitofp %26 : vector<16x96xi32> to vector<16x96xf32>
    %28 = arith.truncf %27 : vector<16x96xf32> to vector<16x96xbf16>
    %cst_12 = arith.constant dense<0.000000e+00> : vector<16x50xf32>
    %29 = tpu.matmul %28, %0, %cst_12 {dimension_numbers = #tpu.dot_dimension_numbers<[1], [0], [0], [1], [0, 0, 1, 1], [], []>} : vector<16x96xbf16>, vector<96x50xbf16>, vector<16x50xf32> -> vector<16x50xf32>
    %30 = arith.truncf %29 : vector<16x50xf32> to vector<16x50xbf16>
    %c0_13 = arith.constant 0 : index
    %c150 = arith.constant 150 : index
    %31 = vector.load %arg8[%c0_13, %c150] : memref<16x700xbf16, #tpu.memory_space<vmem>>, vector<16x50xbf16>
    tpu.vector_store %arg8[%c0_13, %c150], %30 {strides = array<i32>} : memref<16x700xbf16, #tpu.memory_space<vmem>>, vector<16x50xbf16>,
    %c0_14 = arith.constant 0 : index
    %c3 = arith.constant 3 : index
    %32 = vector.load %arg1[%c0_14, %c3] : memref<16x12xi32, #tpu.memory_space<vmem>>, vector<16x1xi32>
    %33 = vector.broadcast %32 : vector<16x1xi32> to vector<16x96xi32>
    %34 = arith.cmpi eq, %33, %1 : vector<16x96xi32>
    %35 = arith.extui %34 : vector<16x96xi1> to vector<16x96xi32>
    %36 = arith.sitofp %35 : vector<16x96xi32> to vector<16x96xf32>
    %37 = arith.truncf %36 : vector<16x96xf32> to vector<16x96xbf16>
    %cst_15 = arith.constant dense<0.000000e+00> : vector<16x50xf32>
    %38 = tpu.matmul %37, %0, %cst_15 {dimension_numbers = #tpu.dot_dimension_numbers<[1], [0], [0], [1], [0, 0, 1, 1], [], []>} : vector<16x96xbf16>, vector<96x50xbf16>, vector<16x50xf32> -> vector<16x50xf32>
    %39 = arith.truncf %38 : vector<16x50xf32> to vector<16x50xbf16>
    %c0_16 = arith.constant 0 : index
    %c200 = arith.constant 200 : index
    %40 = vector.load %arg8[%c0_16, %c200] : memref<16x700xbf16, #tpu.memory_space<vmem>>, vector<16x50xbf16>
    tpu.vector_store %arg8[%c0_16, %c200], %39 {strides = array<i32>} : memref<16x700xbf16, #tpu.memory_space<vmem>>, vector<16x50xbf16>,
    %c0_17 = arith.constant 0 : index
    %c4 = arith.constant 4 : index
    %41 = vector.load %arg1[%c0_17, %c4] : memref<16x12xi32, #tpu.memory_space<vmem>>, vector<16x1xi32>
    %42 = vector.broadcast %41 : vector<16x1xi32> to vector<16x96xi32>
    %43 = arith.cmpi eq, %42, %1 : vector<16x96xi32>
    %44 = arith.extui %43 : vector<16x96xi1> to vector<16x96xi32>
    %45 = arith.sitofp %44 : vector<16x96xi32> to vector<16x96xf32>
    %46 = arith.truncf %45 : vector<16x96xf32> to vector<16x96xbf16>
    %cst_18 = arith.constant dense<0.000000e+00> : vector<16x50xf32>
    %47 = tpu.matmul %46, %0, %cst_18 {dimension_numbers = #tpu.dot_dimension_numbers<[1], [0], [0], [1], [0, 0, 1, 1], [], []>} : vector<16x96xbf16>, vector<96x50xbf16>, vector<16x50xf32> -> vector<16x50xf32>
    %48 = arith.truncf %47 : vector<16x50xf32> to vector<16x50xbf16>
    %c0_19 = arith.constant 0 : index
    %c250 = arith.constant 250 : index
    %49 = vector.load %arg8[%c0_19, %c250] : memref<16x700xbf16, #tpu.memory_space<vmem>>, vector<16x50xbf16>
    tpu.vector_store %arg8[%c0_19, %c250], %48 {strides = array<i32>} : memref<16x700xbf16, #tpu.memory_space<vmem>>, vector<16x50xbf16>,
    %c0_20 = arith.constant 0 : index
    %c5 = arith.constant 5 : index
    %50 = vector.load %arg1[%c0_20, %c5] : memref<16x12xi32, #tpu.memory_space<vmem>>, vector<16x1xi32>
    %51 = vector.broadcast %50 : vector<16x1xi32> to vector<16x96xi32>
    %52 = arith.cmpi eq, %51, %1 : vector<16x96xi32>
    %53 = arith.extui %52 : vector<16x96xi1> to vector<16x96xi32>
    %54 = arith.sitofp %53 : vector<16x96xi32> to vector<16x96xf32>
    %55 = arith.truncf %54 : vector<16x96xf32> to vector<16x96xbf16>
    %cst_21 = arith.constant dense<0.000000e+00> : vector<16x50xf32>
    %56 = tpu.matmul %55, %0, %cst_21 {dimension_numbers = #tpu.dot_dimension_numbers<[1], [0], [0], [1], [0, 0, 1, 1], [], []>} : vector<16x96xbf16>, vector<96x50xbf16>, vector<16x50xf32> -> vector<16x50xf32>
    %57 = arith.truncf %56 : vector<16x50xf32> to vector<16x50xbf16>
    %c0_22 = arith.constant 0 : index
    %c300 = arith.constant 300 : index
    %58 = vector.load %arg8[%c0_22, %c300] : memref<16x700xbf16, #tpu.memory_space<vmem>>, vector<16x50xbf16>
    tpu.vector_store %arg8[%c0_22, %c300], %57 {strides = array<i32>} : memref<16x700xbf16, #tpu.memory_space<vmem>>, vector<16x50xbf16>,
    %c0_23 = arith.constant 0 : index
    %c6 = arith.constant 6 : index
    %59 = vector.load %arg1[%c0_23, %c6] : memref<16x12xi32, #tpu.memory_space<vmem>>, vector<16x1xi32>
    %60 = vector.broadcast %59 : vector<16x1xi32> to vector<16x96xi32>
    %61 = arith.cmpi eq, %60, %1 : vector<16x96xi32>
    %62 = arith.extui %61 : vector<16x96xi1> to vector<16x96xi32>
    %63 = arith.sitofp %62 : vector<16x96xi32> to vector<16x96xf32>
    %64 = arith.truncf %63 : vector<16x96xf32> to vector<16x96xbf16>
    %cst_24 = arith.constant dense<0.000000e+00> : vector<16x50xf32>
    %65 = tpu.matmul %64, %0, %cst_24 {dimension_numbers = #tpu.dot_dimension_numbers<[1], [0], [0], [1], [0, 0, 1, 1], [], []>} : vector<16x96xbf16>, vector<96x50xbf16>, vector<16x50xf32> -> vector<16x50xf32>
    %66 = arith.truncf %65 : vector<16x50xf32> to vector<16x50xbf16>
    %c0_25 = arith.constant 0 : index
    %c350 = arith.constant 350 : index
    %67 = vector.load %arg8[%c0_25, %c350] : memref<16x700xbf16, #tpu.memory_space<vmem>>, vector<16x50xbf16>
    tpu.vector_store %arg8[%c0_25, %c350], %66 {strides = array<i32>} : memref<16x700xbf16, #tpu.memory_space<vmem>>, vector<16x50xbf16>,
    %c0_26 = arith.constant 0 : index
    %c7 = arith.constant 7 : index
    %68 = vector.load %arg1[%c0_26, %c7] : memref<16x12xi32, #tpu.memory_space<vmem>>, vector<16x1xi32>
    %69 = vector.broadcast %68 : vector<16x1xi32> to vector<16x96xi32>
    %70 = arith.cmpi eq, %69, %1 : vector<16x96xi32>
    %71 = arith.extui %70 : vector<16x96xi1> to vector<16x96xi32>
    %72 = arith.sitofp %71 : vector<16x96xi32> to vector<16x96xf32>
    %73 = arith.truncf %72 : vector<16x96xf32> to vector<16x96xbf16>
    %cst_27 = arith.constant dense<0.000000e+00> : vector<16x50xf32>
    %74 = tpu.matmul %73, %0, %cst_27 {dimension_numbers = #tpu.dot_dimension_numbers<[1], [0], [0], [1], [0, 0, 1, 1], [], []>} : vector<16x96xbf16>, vector<96x50xbf16>, vector<16x50xf32> -> vector<16x50xf32>
    %75 = arith.truncf %74 : vector<16x50xf32> to vector<16x50xbf16>
    %c0_28 = arith.constant 0 : index
    %c400 = arith.constant 400 : index
    %76 = vector.load %arg8[%c0_28, %c400] : memref<16x700xbf16, #tpu.memory_space<vmem>>, vector<16x50xbf16>
    tpu.vector_store %arg8[%c0_28, %c400], %75 {strides = array<i32>} : memref<16x700xbf16, #tpu.memory_space<vmem>>, vector<16x50xbf16>,
    %c0_29 = arith.constant 0 : index
    %c8 = arith.constant 8 : index
    %77 = vector.load %arg1[%c0_29, %c8] : memref<16x12xi32, #tpu.memory_space<vmem>>, vector<16x1xi32>
    %78 = vector.broadcast %77 : vector<16x1xi32> to vector<16x96xi32>
    %79 = arith.cmpi eq, %78, %1 : vector<16x96xi32>
    %80 = arith.extui %79 : vector<16x96xi1> to vector<16x96xi32>
    %81 = arith.sitofp %80 : vector<16x96xi32> to vector<16x96xf32>
    %82 = arith.truncf %81 : vector<16x96xf32> to vector<16x96xbf16>
    %cst_30 = arith.constant dense<0.000000e+00> : vector<16x50xf32>
    %83 = tpu.matmul %82, %0, %cst_30 {dimension_numbers = #tpu.dot_dimension_numbers<[1], [0], [0], [1], [0, 0, 1, 1], [], []>} : vector<16x96xbf16>, vector<96x50xbf16>, vector<16x50xf32> -> vector<16x50xf32>
    %84 = arith.truncf %83 : vector<16x50xf32> to vector<16x50xbf16>
    %c0_31 = arith.constant 0 : index
    %c450 = arith.constant 450 : index
    %85 = vector.load %arg8[%c0_31, %c450] : memref<16x700xbf16, #tpu.memory_space<vmem>>, vector<16x50xbf16>
    tpu.vector_store %arg8[%c0_31, %c450], %84 {strides = array<i32>} : memref<16x700xbf16, #tpu.memory_space<vmem>>, vector<16x50xbf16>,
    %c0_32 = arith.constant 0 : index
    %c9 = arith.constant 9 : index
    %86 = vector.load %arg1[%c0_32, %c9] : memref<16x12xi32, #tpu.memory_space<vmem>>, vector<16x1xi32>
    %87 = vector.broadcast %86 : vector<16x1xi32> to vector<16x96xi32>
    %88 = arith.cmpi eq, %87, %1 : vector<16x96xi32>
    %89 = arith.extui %88 : vector<16x96xi1> to vector<16x96xi32>
    %90 = arith.sitofp %89 : vector<16x96xi32> to vector<16x96xf32>
    %91 = arith.truncf %90 : vector<16x96xf32> to vector<16x96xbf16>
    %cst_33 = arith.constant dense<0.000000e+00> : vector<16x50xf32>
    %92 = tpu.matmul %91, %0, %cst_33 {dimension_numbers = #tpu.dot_dimension_numbers<[1], [0], [0], [1], [0, 0, 1, 1], [], []>} : vector<16x96xbf16>, vector<96x50xbf16>, vector<16x50xf32> -> vector<16x50xf32>
    %93 = arith.truncf %92 : vector<16x50xf32> to vector<16x50xbf16>
    %c0_34 = arith.constant 0 : index
    %c500 = arith.constant 500 : index
    %94 = vector.load %arg8[%c0_34, %c500] : memref<16x700xbf16, #tpu.memory_space<vmem>>, vector<16x50xbf16>
    tpu.vector_store %arg8[%c0_34, %c500], %93 {strides = array<i32>} : memref<16x700xbf16, #tpu.memory_space<vmem>>, vector<16x50xbf16>,
    %c0_35 = arith.constant 0 : index
    %c10 = arith.constant 10 : index
    %95 = vector.load %arg1[%c0_35, %c10] : memref<16x12xi32, #tpu.memory_space<vmem>>, vector<16x1xi32>
    %96 = vector.broadcast %95 : vector<16x1xi32> to vector<16x96xi32>
    %97 = arith.cmpi eq, %96, %1 : vector<16x96xi32>
    %98 = arith.extui %97 : vector<16x96xi1> to vector<16x96xi32>
    %99 = arith.sitofp %98 : vector<16x96xi32> to vector<16x96xf32>
    %100 = arith.truncf %99 : vector<16x96xf32> to vector<16x96xbf16>
    %cst_36 = arith.constant dense<0.000000e+00> : vector<16x50xf32>
    %101 = tpu.matmul %100, %0, %cst_36 {dimension_numbers = #tpu.dot_dimension_numbers<[1], [0], [0], [1], [0, 0, 1, 1], [], []>} : vector<16x96xbf16>, vector<96x50xbf16>, vector<16x50xf32> -> vector<16x50xf32>
    %102 = arith.truncf %101 : vector<16x50xf32> to vector<16x50xbf16>
    %c0_37 = arith.constant 0 : index
    %c550 = arith.constant 550 : index
    %103 = vector.load %arg8[%c0_37, %c550] : memref<16x700xbf16, #tpu.memory_space<vmem>>, vector<16x50xbf16>
    tpu.vector_store %arg8[%c0_37, %c550], %102 {strides = array<i32>} : memref<16x700xbf16, #tpu.memory_space<vmem>>, vector<16x50xbf16>,
    %c0_38 = arith.constant 0 : index
    %c11 = arith.constant 11 : index
    %104 = vector.load %arg1[%c0_38, %c11] : memref<16x12xi32, #tpu.memory_space<vmem>>, vector<16x1xi32>
    %105 = vector.broadcast %104 : vector<16x1xi32> to vector<16x96xi32>
    %106 = arith.cmpi eq, %105, %1 : vector<16x96xi32>
    %107 = arith.extui %106 : vector<16x96xi1> to vector<16x96xi32>
    %108 = arith.sitofp %107 : vector<16x96xi32> to vector<16x96xf32>
    %109 = arith.truncf %108 : vector<16x96xf32> to vector<16x96xbf16>
    %cst_39 = arith.constant dense<0.000000e+00> : vector<16x50xf32>
    %110 = tpu.matmul %109, %0, %cst_39 {dimension_numbers = #tpu.dot_dimension_numbers<[1], [0], [0], [1], [0, 0, 1, 1], [], []>} : vector<16x96xbf16>, vector<96x50xbf16>, vector<16x50xf32> -> vector<16x50xf32>
    %111 = arith.truncf %110 : vector<16x50xf32> to vector<16x50xbf16>
    %c0_40 = arith.constant 0 : index
    %c600 = arith.constant 600 : index
    %112 = vector.load %arg8[%c0_40, %c600] : memref<16x700xbf16, #tpu.memory_space<vmem>>, vector<16x50xbf16>
    tpu.vector_store %arg8[%c0_40, %c600], %111 {strides = array<i32>} : memref<16x700xbf16, #tpu.memory_space<vmem>>, vector<16x50xbf16>,
    %c0_41 = arith.constant 0 : index
    %c0_42 = arith.constant 0 : index
    %113 = vector.load %arg3[%c0_41, %c0_42] : memref<250x32xbf16, #tpu.memory_space<vmem>>, vector<250x32xbf16>
    %c0_43 = arith.constant 0 : index
    %c0_44 = arith.constant 0 : index
    %114 = vector.load %arg8[%c0_43, %c0_44] : memref<16x700xbf16, #tpu.memory_space<vmem>>, vector<16x250xbf16>
    %cst_45 = arith.constant dense<0.000000e+00> : vector<16x32xf32>
    %115 = tpu.matmul %114, %113, %cst_45 {dimension_numbers = #tpu.dot_dimension_numbers<[1], [0], [0], [1], [0, 0, 1, 1], [], []>} : vector<16x250xbf16>, vector<250x32xbf16>, vector<16x32xf32> -> vector<16x32xf32>
    %c0_46 = arith.constant 0 : index
    %c50_47 = arith.constant 50 : index
    %116 = vector.load %arg8[%c0_46, %c50_47] : memref<16x700xbf16, #tpu.memory_space<vmem>>, vector<16x250xbf16>
    %cst_48 = arith.constant dense<0.000000e+00> : vector<16x32xf32>
    %117 = tpu.matmul %116, %113, %cst_48 {dimension_numbers = #tpu.dot_dimension_numbers<[1], [0], [0], [1], [0, 0, 1, 1], [], []>} : vector<16x250xbf16>, vector<250x32xbf16>, vector<16x32xf32> -> vector<16x32xf32>
    %118 = arith.maximumf %115, %117 : vector<16x32xf32>
    %c0_49 = arith.constant 0 : index
    %c100_50 = arith.constant 100 : index
    %119 = vector.load %arg8[%c0_49, %c100_50] : memref<16x700xbf16, #tpu.memory_space<vmem>>, vector<16x250xbf16>
    %cst_51 = arith.constant dense<0.000000e+00> : vector<16x32xf32>
    %120 = tpu.matmul %119, %113, %cst_51 {dimension_numbers = #tpu.dot_dimension_numbers<[1], [0], [0], [1], [0, 0, 1, 1], [], []>} : vector<16x250xbf16>, vector<250x32xbf16>, vector<16x32xf32> -> vector<16x32xf32>
    %121 = arith.maximumf %118, %120 : vector<16x32xf32>
    %c0_52 = arith.constant 0 : index
    %c150_53 = arith.constant 150 : index
    %122 = vector.load %arg8[%c0_52, %c150_53] : memref<16x700xbf16, #tpu.memory_space<vmem>>, vector<16x250xbf16>
    %cst_54 = arith.constant dense<0.000000e+00> : vector<16x32xf32>
    %123 = tpu.matmul %122, %113, %cst_54 {dimension_numbers = #tpu.dot_dimension_numbers<[1], [0], [0], [1], [0, 0, 1, 1], [], []>} : vector<16x250xbf16>, vector<250x32xbf16>, vector<16x32xf32> -> vector<16x32xf32>
    %124 = arith.maximumf %121, %123 : vector<16x32xf32>
    %c0_55 = arith.constant 0 : index
    %c200_56 = arith.constant 200 : index
    %125 = vector.load %arg8[%c0_55, %c200_56] : memref<16x700xbf16, #tpu.memory_space<vmem>>, vector<16x250xbf16>
    %cst_57 = arith.constant dense<0.000000e+00> : vector<16x32xf32>
    %126 = tpu.matmul %125, %113, %cst_57 {dimension_numbers = #tpu.dot_dimension_numbers<[1], [0], [0], [1], [0, 0, 1, 1], [], []>} : vector<16x250xbf16>, vector<250x32xbf16>, vector<16x32xf32> -> vector<16x32xf32>
    %127 = arith.maximumf %124, %126 : vector<16x32xf32>
    %c0_58 = arith.constant 0 : index
    %c250_59 = arith.constant 250 : index
    %128 = vector.load %arg8[%c0_58, %c250_59] : memref<16x700xbf16, #tpu.memory_space<vmem>>, vector<16x250xbf16>
    %cst_60 = arith.constant dense<0.000000e+00> : vector<16x32xf32>
    %129 = tpu.matmul %128, %113, %cst_60 {dimension_numbers = #tpu.dot_dimension_numbers<[1], [0], [0], [1], [0, 0, 1, 1], [], []>} : vector<16x250xbf16>, vector<250x32xbf16>, vector<16x32xf32> -> vector<16x32xf32>
    %130 = arith.maximumf %127, %129 : vector<16x32xf32>
    %c0_61 = arith.constant 0 : index
    %c300_62 = arith.constant 300 : index
    %131 = vector.load %arg8[%c0_61, %c300_62] : memref<16x700xbf16, #tpu.memory_space<vmem>>, vector<16x250xbf16>
    %cst_63 = arith.constant dense<0.000000e+00> : vector<16x32xf32>
    %132 = tpu.matmul %131, %113, %cst_63 {dimension_numbers = #tpu.dot_dimension_numbers<[1], [0], [0], [1], [0, 0, 1, 1], [], []>} : vector<16x250xbf16>, vector<250x32xbf16>, vector<16x32xf32> -> vector<16x32xf32>
    %133 = arith.maximumf %130, %132 : vector<16x32xf32>
    %c0_64 = arith.constant 0 : index
    %c350_65 = arith.constant 350 : index
    %134 = vector.load %arg8[%c0_64, %c350_65] : memref<16x700xbf16, #tpu.memory_space<vmem>>, vector<16x250xbf16>
    %cst_66 = arith.constant dense<0.000000e+00> : vector<16x32xf32>
    %135 = tpu.matmul %134, %113, %cst_66 {dimension_numbers = #tpu.dot_dimension_numbers<[1], [0], [0], [1], [0, 0, 1, 1], [], []>} : vector<16x250xbf16>, vector<250x32xbf16>, vector<16x32xf32> -> vector<16x32xf32>
    %136 = arith.maximumf %133, %135 : vector<16x32xf32>
    %c0_67 = arith.constant 0 : index
    %c400_68 = arith.constant 400 : index
    %137 = vector.load %arg8[%c0_67, %c400_68] : memref<16x700xbf16, #tpu.memory_space<vmem>>, vector<16x250xbf16>
    %cst_69 = arith.constant dense<0.000000e+00> : vector<16x32xf32>
    %138 = tpu.matmul %137, %113, %cst_69 {dimension_numbers = #tpu.dot_dimension_numbers<[1], [0], [0], [1], [0, 0, 1, 1], [], []>} : vector<16x250xbf16>, vector<250x32xbf16>, vector<16x32xf32> -> vector<16x32xf32>
    %139 = arith.maximumf %136, %138 : vector<16x32xf32>
    %c0_70 = arith.constant 0 : index
    %c450_71 = arith.constant 450 : index
    %140 = vector.load %arg8[%c0_70, %c450_71] : memref<16x700xbf16, #tpu.memory_space<vmem>>, vector<16x250xbf16>
    %cst_72 = arith.constant dense<0.000000e+00> : vector<16x32xf32>
    %141 = tpu.matmul %140, %113, %cst_72 {dimension_numbers = #tpu.dot_dimension_numbers<[1], [0], [0], [1], [0, 0, 1, 1], [], []>} : vector<16x250xbf16>, vector<250x32xbf16>, vector<16x32xf32> -> vector<16x32xf32>
    %142 = arith.maximumf %139, %141 : vector<16x32xf32>
    %c0_73 = arith.constant 0 : index
    %c0_74 = arith.constant 0 : index
    %143 = vector.load %arg4[%c0_73, %c0_74] : memref<1x32xf32, #tpu.memory_space<vmem>>, vector<1x32xf32>
    %144 = vector.broadcast %143 : vector<1x32xf32> to vector<16x32xf32>
    %145 = arith.addf %142, %144 : vector<16x32xf32>
    %cst_75 = arith.constant 0.000000e+00 : f32
    %146 = vector.broadcast %cst_75 : f32 to vector<16x32xf32>
    %147 = arith.maximumf %145, %146 : vector<16x32xf32>
    %148 = arith.truncf %147 : vector<16x32xf32> to vector<16x32xbf16>
    %c0_76 = arith.constant 0 : index
    %c0_77 = arith.constant 0 : index
    %149 = vector.load %arg5[%c0_76, %c0_77] : memref<32x64xbf16, #tpu.memory_space<vmem>>, vector<32x64xbf16>
    %cst_78 = arith.constant dense<0.000000e+00> : vector<16x64xf32>
    %150 = tpu.matmul %148, %149, %cst_78 {dimension_numbers = #tpu.dot_dimension_numbers<[1], [0], [0], [1], [0, 0, 1, 1], [], []>} : vector<16x32xbf16>, vector<32x64xbf16>, vector<16x64xf32> -> vector<16x64xf32>
    %c0_79 = arith.constant 0 : index
    %c0_80 = arith.constant 0 : index
    %151 = vector.load %arg6[%c0_79, %c0_80] : memref<1x64xf32, #tpu.memory_space<vmem>>, vector<1x64xf32>
    %152 = vector.broadcast %151 : vector<1x64xf32> to vector<16x64xf32>
    %153 = arith.addf %150, %152 : vector<16x64xf32>
    %154 = vector.extract_strided_slice %153 {offsets = [0, 0], sizes = [16, 32], strides = [1, 1]} : vector<16x64xf32> to vector<16x32xf32>
    %cst_81 = arith.constant 0.000000e+00 : f32
    %155 = vector.broadcast %cst_81 : f32 to vector<16x32xf32>
    %156 = arith.maximumf %154, %155 : vector<16x32xf32>
    %157 = vector.extract_strided_slice %153 {offsets = [0, 32], sizes = [16, 32], strides = [1, 1]} : vector<16x64xf32> to vector<16x32xf32>
    %158 = arith.negf %157 : vector<16x32xf32>
    %159 = math.exp %158 : vector<16x32xf32>
    %cst_82 = arith.constant 1.000000e+00 : f32
    %160 = vector.broadcast %cst_82 : f32 to vector<16x32xf32>
    %161 = arith.addf %160, %159 : vector<16x32xf32>
    %162 = arith.divf %160, %161 : vector<16x32xf32>
    %163 = arith.mulf %162, %156 : vector<16x32xf32>
    %cst_83 = arith.constant 1.000000e+00 : f32
    %164 = vector.broadcast %cst_83 : f32 to vector<16x32xf32>
    %165 = arith.subf %164, %162 : vector<16x32xf32>
    %166 = arith.mulf %165, %147 : vector<16x32xf32>
    %167 = arith.addf %163, %166 : vector<16x32xf32>
    %c0_84 = arith.constant 0 : index
    %c0_85 = arith.constant 0 : index
    %168 = vector.load %arg7[%c0_84, %c0_85] : memref<16x32xf32, #tpu.memory_space<vmem>>, vector<16x32xf32>
    tpu.vector_store %arg7[%c0_84, %c0_85], %167 {strides = array<i32>} : memref<16x32xf32, #tpu.memory_space<vmem>>, vector<16x32xf32>,
    return
  }
  func.func @transform_0(%arg0: i32) -> (i32, i32) {
    %c0_i32 = arith.constant 0 : i32
    %c0_i32_0 = arith.constant 0 : i32
    return %arg0, %c0_i32 : i32, i32
  }
  func.func @transform_1(%arg0: i32) -> (i32, i32) {
    %c0_i32 = arith.constant 0 : i32
    %c0_i32_0 = arith.constant 0 : i32
    %c0_i32_1 = arith.constant 0 : i32
    return %c0_i32, %c0_i32_0 : i32, i32
  }
  func.func @transform_2(%arg0: i32) -> (i32, i32) {
    %c0_i32 = arith.constant 0 : i32
    %c0_i32_0 = arith.constant 0 : i32
    %c0_i32_1 = arith.constant 0 : i32
    return %c0_i32, %c0_i32_0 : i32, i32
  }
  func.func @transform_3(%arg0: i32) -> (i32, i32) {
    %c0_i32 = arith.constant 0 : i32
    %c0_i32_0 = arith.constant 0 : i32
    %c0_i32_1 = arith.constant 0 : i32
    return %c0_i32, %c0_i32_0 : i32, i32
  }
  func.func @transform_4(%arg0: i32) -> (i32, i32) {
    %c0_i32 = arith.constant 0 : i32
    %c0_i32_0 = arith.constant 0 : i32
    %c0_i32_1 = arith.constant 0 : i32
    return %c0_i32, %c0_i32_0 : i32, i32
  }
  func.func @transform_5(%arg0: i32) -> (i32, i32) {
    %c0_i32 = arith.constant 0 : i32
    %c0_i32_0 = arith.constant 0 : i32
    %c0_i32_1 = arith.constant 0 : i32
    return %c0_i32, %c0_i32_0 : i32, i32
  }
  func.func @transform_6(%arg0: i32) -> (i32, i32) {
    %c0_i32 = arith.constant 0 : i32
    %c0_i32_0 = arith.constant 0 : i32
    return %arg0, %c0_i32 : i32, i32
  }
}

</mosaic_0001>

<bundles_post_ra>
// kernel: tpu_custom_call.1
= control target key start
LH: loop header
LB: loop body
LE: loop exit
PB: predicated region body
PF: predicated region fallthrough
CT: control target
= control target key end

     0   :  { %v1760_v1 = vmov 2   ;;  %v1761_v2 = vmov 0   ;;  %s2434_s0 = inlined_call_operand.vmem [shape: s32[16,12], index: 0, kind: input, shape index: {}]   ;;  %s2435_s1 = inlined_call_operand.vmem [shape: bf16[96,50], index: 1, kind: input, shape index: {}]   ;;  %s2436_s2 = inlined_call_operand.vmem [shape: bf16[250,32], index: 2, kind: input, shape index: {}]   ;;  %s2437_s3 = inlined_call_operand.vmem [shape: f32[1,32], index: 3, kind: input, shape index: {}]   ;;  %s2438_s4 = inlined_call_operand.vmem [shape: bf16[32,64], index: 4, kind: input, shape index: {}]   ;;  %s2439_s5 = inlined_call_operand.vmem [shape: f32[1,64], index: 5, kind: input, shape index: {}]   ;;  %s2440_s6 = inlined_call_operand.hbm [shape: f32[16,32], index: 6, kind: output, shape index: {}]  }
   0x1   :  { %v1837_v0 = vld [vmem:[%s2434_s0] sm:$0xff]  ;;  %1703 = vset.pattern.permute.xlu0 %v1760_v1  ;;  %1704 = vset.pattern.permute.xlu1 %v1761_v2 }
   0x2   :  { %182 = vperm.xlu0 %1703, %v1837_v0   ;;  %48 = vperm.xlu1 %1704, %v1837_v0  }
   0x3   :  { %11 = vsyncpa [#allocation4], 0  ;;  %v1762_v3 = vmov 1   ;;  %v1846_v4 = vld [vmem:[%s2434_s0 + $0x8] sm:$0xff]  ;;  %v1763_v5 = vmov 3   ;;  %v1764_v6 = vmov 6   ;;  %v37_v20 = vlaneseq }
   0x4   :  { %1705 = vset.pattern.permute.xlu2 %v1762_v3  ;;  %v1765_v7 = vmov 4   ;;  %v1766_v8 = vmov 5   ;;  %v1767_v9 = vmov 9   ;;  %v1863_v10 = vld [vmem:[%s2435_s1 + $0x28] sm:$0xff]  ;;  %v1869_v11 = vld [vmem:[%s2435_s1 + $0x20] sm:$0xff]  ;;  %v1768_v12 = vmov 7  }
   0x5   :  { %130 = vperm.xlu2 %1705, %v1837_v0   ;;  %147 = vmatpush.bf16.msra.mxu1 %v1863_v10  ;;  %v1769_v13 = vmov 11   ;;  %v1880_v14 = vld [vmem:[%s2435_s1 + $0x18] sm:$0xff]  ;;  %v1770_v15 = vmov 8   ;;  %v1896_v16 = vld [vmem:[%s2435_s1 + $0x10] sm:$0xff]  ;;  %v1903_v17 = vld [vmem:[%s2435_s1 + $0x8] sm:$0xff]  ;;  %v1771_v18 = vmov 10  }
   0x6   :  { %102 = vmatpush.bf16.msra.mxu0 %v1863_v10  ;;  %199 = vmatpush.bf16.msra.mxu2 %v1863_v10  ;;  %v1916_v19 = vld [vmem:[%s2435_s1] sm:$0xff]  ;;  %v1942_v22 = vand.u32 127, %v37_v20  ;;  %v1772_v23 = vmov 0.0   ;;  %vm96_vm2 = vcmask 785408   ;;  %s1773_s1 = smov 100   ;;  %s1774_s12 = smov 50  }
   0x7   :  { %244 = vmatpush.bf16.msra.mxu3 %v1863_v10  ;;  %s1775_s13 = smov 22   ;;  %s1776_s14 = smov 72  }
   0x8   :  { %s1777_s15 = smov 122   ;;  %s1778_s16 = smov 94  }
   0x9   :  { %148 = vmatpush.bf16.msra.mxu1 %v1869_v11  ;;  %s1779_s17 = smov 44   ;;  %s1780_s18 = smov 116  }
   0xa   :  { %185 = vperm.xlu0 %1703, %v1846_v4   ;;  %51 = vperm.xlu1 %1704, %v1846_v4   ;;  %s1781_s19 = smov 16   ;;  %s1782_s20 = smov 66  }
   0xb   :  { %103 = vmatpush.bf16.msra.mxu0 %v1869_v11  ;;  %200 = vmatpush.bf16.msra.mxu2 %v1869_v11  ;;  %s1783_s21 = smov 88   ;;  %s1784_s22 = smov 38  }
   0xc   :  { %245 = vmatpush.bf16.msra.mxu3 %v1869_v11  ;;  %s1786_s30 = smov 106   ;;  %s1787_s7 = smov 28  }
   0xd   :  { %133 = vperm.xlu2 %1705, %v1846_v4   ;;  %149 = vmatpush.bf16.msra.mxu1 %v1880_v14  ;;  %s1788_s8 = smov 6   ;;  %s1789_s9 = smov 56  }
   0xe   :  { %s1790_s10 = smov 34   ;;  %s1791_s11 = smov 84  }
   0xf   :  { %104 = vmatpush.bf16.msra.mxu0 %v1880_v14  ;;  %201 = vmatpush.bf16.msra.mxu2 %v1880_v14  ;;  %s1413_s24 = sshll.u32 %s2440_s6, 4  ;;  %s1797_s0 = smov 128   ;;  %s1414_s24 = int_to_ptr.hbm [resolvable:$true] %s1413_s24 }
  0x10   :  { %246 = vmatpush.bf16.msra.mxu3 %v1880_v14  ;;  %s1798_s25 = smov 8  }
  0x11   :  { %150 = vmatpush.bf16.msra.mxu1 %v1896_v16 }
  0x12   :  { %1706 = vset.pattern.permute.xlu0 %v1763_v5  ;;  %1707 = vset.pattern.permute.xlu1 %v1763_v5 }
  0x13   :  { %227 = vperm.xlu0 %1706, %v1837_v0   ;;  %230 = vperm.xlu1 %1707, %v1846_v4  }
  0x14   :  { %105 = vmatpush.bf16.msra.mxu0 %v1896_v16  ;;  %202 = vmatpush.bf16.msra.mxu2 %v1896_v16 }
  0x15   :  { %1708 = vset.pattern.permute.xlu2 %v1764_v6  ;;  %247 = vmatpush.bf16.msra.mxu3 %v1896_v16 }
  0x16   :  { %369 = vperm.xlu2 %1708, %v1837_v0   ;;  %151 = vmatpush.bf16.msra.mxu1 %v1903_v17 }
  0x18   :  { %106 = vmatpush.bf16.msra.mxu0 %v1903_v17  ;;  %203 = vmatpush.bf16.msra.mxu2 %v1903_v17 }
  0x19   :  { %248 = vmatpush.bf16.msra.mxu3 %v1903_v17 }
  0x1a   :  { %152 = vmatpush.bf16.msra.mxu1 %v1916_v19 }
  0x1b   :  { %1711 = vset.pattern.permute.xlu0 %v1765_v7  ;;  %1709 = vset.pattern.permute.xlu1 %v1764_v6 }
  0x1c   :  { %275 = vperm.xlu0 %1711, %v1846_v4   ;;  %372 = vperm.xlu1 %1709, %v1846_v4  }
  0x1d   :  { %107 = vmatpush.bf16.msra.mxu0 %v1916_v19  ;;  %204 = vmatpush.bf16.msra.mxu2 %v1916_v19 }
  0x1e   :  { %1710 = vset.pattern.permute.xlu2 %v1765_v7  ;;  %341 = vmatpush.bf16.msrb.mxu1 %v1863_v10 }
  0x1f   :  { %272 = vperm.xlu2 %1710, %v1837_v0   ;;  %249 = vmatpush.bf16.msra.mxu3 %v1916_v19 }
  0x21   :  { %289 = vmatpush.bf16.msrb.mxu0 %v1863_v10  ;;  %386 = vmatpush.bf16.msrb.mxu2 %v1863_v10 }
  0x22   :  { %342 = vmatpush.bf16.msrb.mxu1 %v1869_v11 }
  0x23   :  { %438 = vmatpush.bf16.msrb.mxu3 %v1863_v10 }
  0x24   :  { %1712 = vset.pattern.permute.xlu1 %v1766_v8  ;;  %1716 = vset.pattern.permute.xlu0 %v1767_v9 }
  0x25   :  { %324 = vperm.xlu1 %1712, %v1837_v0   ;;  %511 = vperm.xlu0 %1716, %v1837_v0  }
  0x26   :  { %290 = vmatpush.bf16.msrb.mxu0 %v1869_v11  ;;  %387 = vmatpush.bf16.msrb.mxu2 %v1869_v11 }
  0x27   :  { %1713 = vset.pattern.permute.xlu2 %v1766_v8  ;;  %439 = vmatpush.bf16.msrb.mxu3 %v1869_v11 }
  0x28   :  { %327 = vperm.xlu2 %1713, %v1846_v4   ;;  %343 = vmatpush.bf16.msrb.mxu1 %v1880_v14 }
  0x2a   :  { %291 = vmatpush.bf16.msrb.mxu0 %v1880_v14  ;;  %388 = vmatpush.bf16.msrb.mxu2 %v1880_v14 }
  0x2b   :  { %440 = vmatpush.bf16.msrb.mxu3 %v1880_v14 }
  0x2c   :  { %344 = vmatpush.bf16.msrb.mxu1 %v1896_v16 }
  0x2d   :  { %1714 = vset.pattern.permute.xlu1 %v1768_v12  ;;  %1721 = vset.pattern.permute.xlu0 %v1769_v13 }
  0x2e   :  { %421 = vperm.xlu1 %1714, %v1837_v0   ;;  %611 = vperm.xlu0 %1721, %v1846_v4  }
  0x2f   :  { %292 = vmatpush.bf16.msrb.mxu0 %v1896_v16  ;;  %389 = vmatpush.bf16.msrb.mxu2 %v1896_v16 }
  0x30   :  { %1715 = vset.pattern.permute.xlu2 %v1768_v12  ;;  %441 = vmatpush.bf16.msrb.mxu3 %v1896_v16 }
  0x31   :  { %424 = vperm.xlu2 %1715, %v1846_v4   ;;  %345 = vmatpush.bf16.msrb.mxu1 %v1903_v17 }
  0x33   :  { %293 = vmatpush.bf16.msrb.mxu0 %v1903_v17  ;;  %390 = vmatpush.bf16.msrb.mxu2 %v1903_v17 }
  0x34   :  { %442 = vmatpush.bf16.msrb.mxu3 %v1903_v17 }
  0x35   :  { %346 = vmatpush.bf16.msrb.mxu1 %v1916_v19 }
  0x36   :  { %1717 = vset.pattern.permute.xlu1 %v1767_v9 }
  0x37   :  { %514 = vperm.xlu1 %1717, %v1846_v4   ;;  %294 = vmatpush.bf16.msrb.mxu0 %v1916_v19 }
  0x38   :  { %391 = vmatpush.bf16.msrb.mxu2 %v1916_v19  ;;  %443 = vmatpush.bf16.msrb.mxu3 %v1916_v19 }
  0x39   :  { %1718 = vset.pattern.permute.xlu2 %v1770_v15 }
  0x3a   :  { %466 = vperm.xlu2 %1718, %v1837_v0  }
  0x3f   :  { %1719 = vset.pattern.permute.xlu1 %v1770_v15 }
  0x40   :  { %469 = vperm.xlu1 %1719, %v1846_v4  }
  0x42   :  { %1720 = vset.pattern.permute.xlu2 %v1769_v13 }
  0x43   :  { %608 = vperm.xlu2 %1720, %v1837_v0  }
  0x48   :  { %1722 = vset.pattern.permute.xlu1 %v1771_v18 }
  0x49   :  { %563 = vperm.xlu1 %1722, %v1837_v0  }
  0x4b   :  { %1723 = vset.pattern.permute.xlu2 %v1771_v18 }
  0x4c   :  { %566 = vperm.xlu2 %1723, %v1846_v4  }
  0x5f   :  { %v131_v21 = vpop.permute.xlu2 %130 }
  0x60   :  { %vm135_vm0 = vcmp.eq.s32.totalorder %v131_v21, %v1942_v22 }
  0x61   :  { %v1452_v24 = vsel %vm135_vm0, 1.0, %v1772_v23 }
  0x67   :  { %v134_v25 = vpop.permute.xlu2 %133 }
  0x68   :  { %vm136_vm1 = vcmp.eq.s32.totalorder %v134_v25, %v1942_v22 }
  0x69   :  { %v1453_v26 = vsel %vm136_vm1, 1.0, %v1772_v23 }
  0x6a   :  { %v141_v27 = vpack.c.bf16 %v1453_v26, %v1452_v24 }
  0x6c   :  { %1454 = vmatmul.msk.bf16.vlgmr.msra.gmra.mxu1 %vm96_vm2, %v141_v27 }
  0x6d   :  { %528 = vmatpush.bf16.msra.mxu1 %v1863_v10 }
  0x70   :  { %v370_v30 = vpop.permute.xlu2 %369 }
  0x71   :  { %529 = vmatpush.bf16.msra.mxu1 %v1869_v11  ;;  %vm374_vm10 = vcmp.eq.s32.totalorder %v370_v30, %v1942_v22 }
  0x72   :  { %v1467_v49 = vsel %vm374_vm10, 1.0, %v1772_v23  ;;  %vm799_vm10 = vcmask 1044480  }
  0x74   :  { %v183_v28 = vpop.permute.xlu0 %182  ;;  %v49_v29 = vpop.permute.xlu1 %48 }
  0x75   :  { %530 = vmatpush.bf16.msra.mxu1 %v1880_v14  ;;  %vm187_vm3 = vcmp.eq.s32.totalorder %v183_v28, %v1942_v22  ;;  %vm53_vm4 = vcmp.eq.s32.totalorder %v49_v29, %v1942_v22 }
  0x76   :  { %v1455_v33 = vsel %vm187_vm3, 1.0, %v1772_v23  ;;  %v1425_v34 = vsel %vm53_vm4, 1.0, %v1772_v23 }
  0x79   :  { %531 = vmatpush.bf16.msra.mxu1 %v1896_v16  ;;  %v273_v39 = vpop.permute.xlu2 %272 }
  0x7a   :  { %vm277_vm9 = vcmp.eq.s32.totalorder %v273_v39, %v1942_v22 }
  0x7b   :  { %v1461_v47 = vsel %vm277_vm9, 1.0, %v1772_v23 }
  0x7c   :  { %v186_v31 = vpop.permute.xlu0 %185  ;;  %v52_v32 = vpop.permute.xlu1 %51 }
  0x7d   :  { %532 = vmatpush.bf16.msra.mxu1 %v1903_v17  ;;  %vm188_vm5 = vcmp.eq.s32.totalorder %v186_v31, %v1942_v22  ;;  %vm54_vm6 = vcmp.eq.s32.totalorder %v52_v32, %v1942_v22 }
  0x7e   :  { %v1456_v35 = vsel %vm188_vm5, 1.0, %v1772_v23  ;;  %v1426_v36 = vsel %vm54_vm6, 1.0, %v1772_v23 }
  0x7f   :  { %v193_v37 = vpack.c.bf16 %v1456_v35, %v1455_v33  ;;  %v59_v38 = vpack.c.bf16 %v1426_v36, %v1425_v34 }
  0x81   :  { %533 = vmatpush.bf16.msra.mxu1 %v1916_v19  ;;  %1451 = vmatmul.msk.bf16.vlgmr.msra.gmra.mxu0 %vm96_vm2, %v59_v38 }
  0x82   :  { %1457 = vmatmul.msk.bf16.vlgmr.msra.gmra.mxu2 %vm96_vm2, %v193_v37  ;;  %483 = vmatpush.bf16.msra.mxu0 %v1863_v10  ;;  %v328_v45 = vpop.permute.xlu2 %327 }
  0x83   :  { %580 = vmatpush.bf16.msra.mxu2 %v1863_v10  ;;  %vm330_vm13 = vcmp.eq.s32.totalorder %v328_v45, %v1942_v22 }
  0x84   :  { %v1465_v54 = vsel %vm330_vm13, 1.0, %v1772_v23  ;;  %vm124_vm13 = vcmask 814480  }
  0x85   :  { %v228_v40 = vpop.permute.xlu0 %227  ;;  %v231_v41 = vpop.permute.xlu1 %230 }
  0x86   :  { %vm232_vm7 = vcmp.eq.s32.totalorder %v228_v40, %v1942_v22  ;;  %vm233_vm8 = vcmp.eq.s32.totalorder %v231_v41, %v1942_v22  ;;  %484 = vmatpush.bf16.msra.mxu0 %v1869_v11 }
  0x87   :  { %581 = vmatpush.bf16.msra.mxu2 %v1869_v11  ;;  %v1458_v42 = vsel %vm232_vm7, 1.0, %v1772_v23  ;;  %v1459_v43 = vsel %vm233_vm8, 1.0, %v1772_v23 }
  0x88   :  { %v238_v44 = vpack.c.bf16 %v1459_v43, %v1458_v42 }
  0x8a   :  { %1460 = vmatmul.msk.bf16.vlgmr.msra.gmra.mxu3 %vm96_vm2, %v238_v44  ;;  %485 = vmatpush.bf16.msra.mxu0 %v1880_v14 }
  0x8b   :  { %625 = vmatpush.bf16.msra.mxu3 %v1863_v10  ;;  %582 = vmatpush.bf16.msra.mxu2 %v1880_v14  ;;  %v425_v56 = vpop.permute.xlu2 %424 }
  0x8c   :  { %vm427_vm15 = vcmp.eq.s32.totalorder %v425_v56, %v1942_v22 }
  0x8d   :  { %v1471_v60 = vsel %vm427_vm15, 1.0, %v1772_v23  ;;  %vm169_vm15 = vcmask 818176  }
  0x8e   :  { %v276_v46 = vpop.permute.xlu0 %275  ;;  %v373_v48 = vpop.permute.xlu1 %372  ;;  %486 = vmatpush.bf16.msra.mxu0 %v1896_v16 }
  0x8f   :  { %vm278_vm11 = vcmp.eq.s32.totalorder %v276_v46, %v1942_v22  ;;  %vm375_vm12 = vcmp.eq.s32.totalorder %v373_v48, %v1942_v22  ;;  %626 = vmatpush.bf16.msra.mxu3 %v1869_v11  ;;  %583 = vmatpush.bf16.msra.mxu2 %v1896_v16 }
  0x90   :  { %v1462_v50 = vsel %vm278_vm11, 1.0, %v1772_v23  ;;  %v1468_v51 = vsel %vm375_vm12, 1.0, %v1772_v23  ;;  %vm174_vm11 = vcmask 1044256   ;;  %vm175_vm12 = vcmask 179204  }
  0x91   :  { %v283_v52 = vpack.c.bf16 %v1462_v50, %v1461_v47  ;;  %v380_v53 = vpack.c.bf16 %v1468_v51, %v1467_v49 }
  0x92   :  { %487 = vmatpush.bf16.msra.mxu0 %v1903_v17 }
  0x93   :  { %1463 = vmatmul.msk.bf16.vlgmr.msrb.gmra.mxu0 %vm96_vm2, %v283_v52  ;;  %1469 = vmatmul.msk.bf16.vlgmr.msrb.gmra.mxu2 %vm96_vm2, %v380_v53 }
  0x94   :  { %627 = vmatpush.bf16.msra.mxu3 %v1880_v14  ;;  %584 = vmatpush.bf16.msra.mxu2 %v1903_v17  ;;  %v467_v59 = vpop.permute.xlu2 %466 }
  0x95   :  { %vm471_vm6 = vcmp.eq.s32.totalorder %v467_v59, %v1942_v22 }
  0x96   :  { %488 = vmatpush.bf16.msra.mxu0 %v1916_v19  ;;  %v1473_v11 = vsel %vm471_vm6, 1.0, %v1772_v23 }
  0x97   :  { %v325_v55 = vpop.permute.xlu1 %324  ;;  %v512_v62 = vpop.permute.xlu0 %511 }
  0x98   :  { %vm329_vm14 = vcmp.eq.s32.totalorder %v325_v55, %v1942_v22  ;;  %628 = vmatpush.bf16.msra.mxu3 %v1896_v16  ;;  %585 = vmatpush.bf16.msra.mxu2 %v1916_v19  ;;  %vm516_vm1 = vcmp.eq.s32.totalorder %v512_v62, %v1942_v22 }
  0x99   :  { %v1464_v57 = vsel %vm329_vm14, 1.0, %v1772_v23  ;;  %v1476_v3 = vsel %vm516_vm1, 1.0, %v1772_v23  ;;  %vm2140_vm14 = vmor %vm175_vm12, %vm174_vm11  ;;  %vm316_vm1 = vcmask 1044432   ;;  %vm460_vm11 = vcmask 535680  }
  0x9a   :  { %v335_v58 = vpack.c.bf16 %v1465_v54, %v1464_v57  ;;  %vm42_vm12 = vcmask 486480  }
  0x9b   :  { %43 = vst.msk [vmem:[#allocation2 + $0x14] sm:$0xf] %vm42_vm12, %v1761_v2 }
  0x9c   :  { %1466 = vmatmul.msk.bf16.vlgmr.msrb.gmra.mxu1 %vm96_vm2, %v335_v58  ;;  %629 = vmatpush.bf16.msra.mxu3 %v1903_v17  ;;  %44 = vst.msk [vmem:[#allocation2 + $0x2c] sm:$0xf] %vm42_vm12, %v1761_v2  ;;  %vm1000_vm12 = vcmask 457728  }
  0x9d   :  { %v609_v5 = vpop.permute.xlu2 %608 }
  0x9e   :  { %vm613_vm4 = vcmp.eq.s32.totalorder %v609_v5, %v1942_v22 }
  0x9f   :  { %v1482_v8 = vsel %vm613_vm4, 1.0, %v1772_v23  ;;  %vm311_vm4 = vcmask 998400  }
  0xa0   :  { %v422_v61 = vpop.permute.xlu1 %421  ;;  %630 = vmatpush.bf16.msra.mxu3 %v1916_v19  ;;  %v612_v1 = vpop.permute.xlu0 %611 }
  0xa1   :  { %vm426_vm0 = vcmp.eq.s32.totalorder %v422_v61, %v1942_v22  ;;  %vm614_vm5 = vcmp.eq.s32.totalorder %v612_v1, %v1942_v22 }
  0xa2   :  { %v1470_v63 = vsel %vm426_vm0, 1.0, %v1772_v23  ;;  %v1483_v9 = vsel %vm614_vm5, 1.0, %v1772_v23  ;;  %vm221_vm0 = vcmask 584880   ;;  %vm266_vm5 = vcmask 994880  }
  0xa3   :  { %v432_v0 = vpack.c.bf16 %v1471_v60, %v1470_v63  ;;  %v619_v10 = vpack.c.bf16 %v1483_v9, %v1482_v8  ;;  %v2059_v8 = vld [vmem:[%s2436_s2 + $0x20] sm:$0xff]  ;;  %v1555_v9 = vld [vmem:[%s2436_s2 + $0x78] sm:$0xf] }
  0xa5   :  { %1472 = vmatmul.msk.bf16.vlgmr.msrb.gmra.mxu3 %vm96_vm2, %v432_v0 }
  0xa6   :  { %v567_v15 = vpop.permute.xlu2 %566 }
  0xa7   :  { %vm569_vm8 = vcmp.eq.s32.totalorder %v567_v15, %v1942_v22  ;;  %v2089_v15 = vld [vmem:[%s2436_s2 + $0x10] sm:$0xff] }
  0xa8   :  { %v1480_v16 = vsel %vm569_vm8, 1.0, %v1772_v23  ;;  %vm414_vm8 = vcmask 130052  }
  0xa9   :  { %v515_v4 = vpop.permute.xlu1 %514 }
  0xaa   :  { %vm517_vm3 = vcmp.eq.s32.totalorder %v515_v4, %v1942_v22 }
  0xab   :  { %v1477_v6 = vsel %vm517_vm3, 1.0, %v1772_v23  ;;  %vm317_vm3 = vcmask 359428  }
  0xac   :  { %v522_v7 = vpack.c.bf16 %v1477_v6, %v1476_v3  ;;  %v2036_v3 = vld [vmem:[%s2436_s2 + $0x38] sm:$0xff]  ;;  %v2043_v6 = vld [vmem:[%s2436_s2 + $0x30] sm:$0xff]  ;;  %vm2183_vm6 = vmor %vm317_vm3, %vm316_vm1  ;;  %vm550_vm1 = vcmask 949248   ;;  %vm652_vm3 = vcmask 1044160  }
  0xad   :  { %803 = vmatpush.bf16.msrb.mxu0 %v2036_v3  ;;  %861 = vmatpush.bf16.msrb.mxu2 %v2036_v3 }
  0xae   :  { %1478 = vmatmul.msk.bf16.vlgmr.msra.gmra.mxu1 %vm96_vm2, %v522_v7  ;;  %v2052_v7 = vld [vmem:[%s2436_s2 + $0x28] sm:$0xff] }
  0xb1   :  { %804 = vmatpush.bf16.msrb.mxu0 %v2043_v6  ;;  %862 = vmatpush.bf16.msrb.mxu2 %v2043_v6 }
  0xb2   :  { %v470_v12 = vpop.permute.xlu1 %469 }
  0xb3   :  { %vm472_vm7 = vcmp.eq.s32.totalorder %v470_v12, %v1942_v22 }
  0xb4   :  { %v1474_v13 = vsel %vm472_vm7, 1.0, %v1772_v23  ;;  %vm413_vm7 = vcmask 1044208  }
  0xb5   :  { %v477_v14 = vpack.c.bf16 %v1474_v13, %v1473_v11  ;;  %1484 = vmatmul.msk.bf16.vlgmr.msra.gmra.mxu3 %vm96_vm2, %v619_v10  ;;  %805 = vmatpush.bf16.msrb.mxu0 %v2052_v7  ;;  %v1647_v10 = vld [vmem:[%s2436_s2 + $0x78] sm:$0x10] }
  0xb6   :  { %863 = vmatpush.bf16.msrb.mxu2 %v2052_v7  ;;  %v1556_v11 = vor.u32 %v1647_v10, %v1555_v9  ;;  %v2075_v13 = vld [vmem:[%s2436_s2 + $0x18] sm:$0xff] }
  0xb7   :  { %1475 = vmatmul.msk.bf16.vlgmr.msra.gmra.mxu0 %vm96_vm2, %v477_v14  ;;  %v2080_v14 = vld [vmem:[%s2436_s2 + $0x70] sm:$0xff] }
  0xb8   :  { %v2069_v12 = vsel %vm799_vm10, %v1556_v11, 0  ;;  %vm2213_vm10 = vmor %vm414_vm8, %vm413_vm7  ;;  %vm647_vm7 = vcmask 719872  }
  0xb9   :  { %806 = vmatpush.bf16.msrb.mxu0 %v2059_v8  ;;  %817 = vmatpush.bf16.msrb.mxu1 %v2069_v12 }
  0xba   :  { %864 = vmatpush.bf16.msrb.mxu2 %v2059_v8  ;;  %875 = vmatpush.bf16.msrb.mxu3 %v2069_v12 }
  0xbb   :  { %v564_v17 = vpop.permute.xlu1 %563 }
  0xbc   :  { %vm568_vm9 = vcmp.eq.s32.totalorder %v564_v17, %v1942_v22  ;;  %v2099_v17 = vld [vmem:[%s2436_s2 + $0x68] sm:$0xff] }
  0xbd   :  { %v1479_v18 = vsel %vm568_vm9, 1.0, %v1772_v23  ;;  %807 = vmatpush.bf16.msrb.mxu0 %v2075_v13  ;;  %818 = vmatpush.bf16.msrb.mxu1 %v2080_v14  ;;  %vm363_vm9 = vcmask 765280  }
  0xbe   :  { %v574_v19 = vpack.c.bf16 %v1480_v16, %v1479_v18  ;;  %865 = vmatpush.bf16.msrb.mxu2 %v2075_v13  ;;  %876 = vmatpush.bf16.msrb.mxu3 %v2080_v14  ;;  %v2105_v18 = vld [vmem:[%s2436_s2 + $0x8] sm:$0xff] }
  0xc0   :  { %1481 = vmatmul.msk.bf16.vlgmr.msra.gmra.mxu2 %vm96_vm2, %v574_v19  ;;  %vm39_vm2 = vcmask 404480   ;;  %v2110_v19 = vld [vmem:[%s2436_s2 + $0x60] sm:$0xff] }
  0xc1   :  { %40 = vst.msk [vmem:[#allocation2] sm:$0xf] %vm39_vm2, %v1761_v2  ;;  %808 = vmatpush.bf16.msrb.mxu0 %v2089_v15  ;;  %819 = vmatpush.bf16.msrb.mxu1 %v2099_v17 }
  0xc2   :  { %41 = vst.msk [vmem:[#allocation2 + $0x18] sm:$0xf] %vm39_vm2, %v1761_v2  ;;  %866 = vmatpush.bf16.msrb.mxu2 %v2089_v15  ;;  %877 = vmatpush.bf16.msrb.mxu3 %v2099_v17  ;;  %vm408_vm2 = vcmask 769024  }
  0xc5   :  { %809 = vmatpush.bf16.msrb.mxu0 %v2105_v18  ;;  %820 = vmatpush.bf16.msrb.mxu1 %v2110_v19 }
  0xc6   :  { %867 = vmatpush.bf16.msrb.mxu2 %v2105_v18  ;;  %878 = vmatpush.bf16.msrb.mxu3 %v2110_v19 }
  0xe9   :  { %v154_v20 = vpop.f32.mrf.mxu1 }
  0xea   :  { %v159_v21 = vpack.c.bf16 %v154_v20, %v154_v20  ;;  %v2118_v20 = vld [vmem:[%s2436_s2] sm:$0xff] }
  0xeb   :  { %810 = vmatpush.bf16.msrb.mxu0 %v2118_v20  ;;  %868 = vmatpush.bf16.msrb.mxu2 %v2118_v20 }
  0xec   :  { %163 = vrot.lane.b32.xlu1 %v159_v21, %s1773_s1  ;;  %v2125_v21 = vld [vmem:[%s2436_s2 + $0x58] sm:$0xff] }
  0xed   :  { %821 = vmatpush.bf16.msrb.mxu1 %v2125_v21  ;;  %879 = vmatpush.bf16.msrb.mxu3 %v2125_v21 }
  0xef   :  { %904 = vmatpush.bf16.msra.mxu0 %v2036_v3  ;;  %964 = vmatpush.bf16.msra.mxu2 %v2036_v3 }
  0xf1   :  { %v156_v24 = vpop.f32.mrf.mxu1 }
  0xf2   :  { %v160_v25 = vpack.c.bf16 %v156_v24, %v156_v24 }
  0xf3   :  { %905 = vmatpush.bf16.msra.mxu0 %v2043_v6  ;;  %965 = vmatpush.bf16.msra.mxu2 %v2043_v6 }
  0xf4   :  { %165 = vrot.lane.b32.xlu2 %v160_v25, %s1773_s1  ;;  %s1792_s1 = smov 62  }
  0xf7   :  { %906 = vmatpush.bf16.msra.mxu0 %v2052_v7  ;;  %966 = vmatpush.bf16.msra.mxu2 %v2052_v7 }
  0xfb   :  { %907 = vmatpush.bf16.msra.mxu0 %v2059_v8  ;;  %967 = vmatpush.bf16.msra.mxu2 %v2059_v8 }
  0xfe   :  { %v109_v26 = vpop.f32.mrf.mxu0 }
  0xff   :  { %v114_v27 = vpack.c.bf16 %v109_v26, %v109_v26  ;;  %908 = vmatpush.bf16.msra.mxu0 %v2075_v13  ;;  %968 = vmatpush.bf16.msra.mxu2 %v2075_v13 }
 0x101   :  { %118 = vrot.lane.b32.xlu0 %v114_v27, %s1774_s12  ;;  %v2136_v27 = vld [vmem:[%s2436_s2 + $0x50] sm:$0xff] }
 0x102   :  { %822 = vmatpush.bf16.msrb.mxu1 %v2136_v27  ;;  %880 = vmatpush.bf16.msrb.mxu3 %v2136_v27 }
 0x103   :  { %909 = vmatpush.bf16.msra.mxu0 %v2089_v15  ;;  %969 = vmatpush.bf16.msra.mxu2 %v2089_v15 }
 0x105   :  { %v206_v28 = vpop.f32.mrf.mxu2 }
 0x106   :  { %v211_v29 = vpack.c.bf16 %v206_v28, %v206_v28  ;;  %v111_v22 = vpop.f32.mrf.mxu0 }
 0x107   :  { %v115_v30 = vpack.c.bf16 %v111_v22, %v111_v22  ;;  %910 = vmatpush.bf16.msra.mxu0 %v2105_v18  ;;  %970 = vmatpush.bf16.msra.mxu2 %v2105_v18 }
 0x108   :  { %215 = vrot.lane.b32.xlu1 %v211_v29, %s1775_s13 }
 0x10b   :  { %911 = vmatpush.bf16.msra.mxu0 %v2118_v20  ;;  %971 = vmatpush.bf16.msra.mxu2 %v2118_v20 }
 0x10d   :  { %v208_v23 = vpop.f32.mrf.mxu2  ;;  %v251_v32 = vpop.f32.mrf.mxu3 }
 0x10e   :  { %v212_v31 = vpack.c.bf16 %v208_v23, %v208_v23  ;;  %v256_v33 = vpack.c.bf16 %v251_v32, %v251_v32  ;;  %v2151_v23 = vld [vmem:[%s2436_s2 + $0x48] sm:$0xff] }
 0x10f   :  { %823 = vmatpush.bf16.msrb.mxu1 %v2151_v23  ;;  %881 = vmatpush.bf16.msrb.mxu3 %v2151_v23 }
 0x110   :  { %217 = vrot.lane.b32.xlu2 %v212_v31, %s1775_s13  ;;  %120 = vrot.lane.b32.xlu1 %v115_v30, %s1774_s12  ;;  %v296_v34 = vpop.f32.mrf.mxu0  ;;  %v2162_v31 = vld [vmem:[%s2436_s2 + $0x40] sm:$0xff]  ;;  %s1785_s2 = smov 78   ;;  %s1793_s12 = smov 112  }
 0x111   :  { %260 = vrot.lane.b32.xlu0 %v256_v33, %s1776_s14  ;;  %v301_v35 = vpack.c.bf16 %v296_v34, %v296_v34 }
 0x113   :  { %824 = vmatpush.bf16.msrb.mxu1 %v2162_v31  ;;  %882 = vmatpush.bf16.msrb.mxu3 %v2162_v31 }
 0x115   :  { %v253_v36 = vpop.f32.mrf.mxu3 }
 0x116   :  { %v257_v37 = vpack.c.bf16 %v253_v36, %v253_v36  ;;  %v393_v38 = vpop.f32.mrf.mxu2 }
 0x117   :  { %v398_v42 = vpack.c.bf16 %v393_v38, %v393_v38  ;;  %978 = vmatpush.bf16.msra.mxu3 %v2069_v12  ;;  %918 = vmatpush.bf16.msra.mxu1 %v2069_v12 }
 0x118   :  { %305 = vrot.lane.b32.xlu2 %v301_v35, %s1777_s15  ;;  %v298_v39 = vpop.f32.mrf.mxu0  ;;  %262 = vrot.lane.b32.xlu1 %v257_v37, %s1776_s14 }
 0x119   :  { %v302_v40 = vpack.c.bf16 %v298_v39, %v298_v39  ;;  %v348_v41 = vpop.f32.mrf.mxu1 }
 0x11a   :  { %v353_v43 = vpack.c.bf16 %v348_v41, %v348_v41 }
 0x11b   :  { %307 = vrot.lane.b32.xlu0 %v302_v40, %s1777_s15  ;;  %979 = vmatpush.bf16.msra.mxu3 %v2080_v14 }
 0x11c   :  { %919 = vmatpush.bf16.msra.mxu1 %v2080_v14 }
 0x11e   :  { %v395_v44 = vpop.f32.mrf.mxu2 }
 0x11f   :  { %v399_v45 = vpack.c.bf16 %v395_v44, %v395_v44  ;;  %980 = vmatpush.bf16.msra.mxu3 %v2099_v17 }
 0x120   :  { %402 = vrot.lane.b32.xlu2 %v398_v42, %s1778_s16  ;;  %357 = vrot.lane.b32.xlu1 %v353_v43, %s1779_s17 }
 0x121   :  { %v350_v46 = vpop.f32.mrf.mxu1  ;;  %920 = vmatpush.bf16.msra.mxu1 %v2099_v17 }
 0x122   :  { %v354_v47 = vpack.c.bf16 %v350_v46, %v350_v46 }
 0x123   :  { %404 = vrot.lane.b32.xlu0 %v399_v45, %s1778_s16  ;;  %981 = vmatpush.bf16.msra.mxu3 %v2110_v19 }
 0x125   :  { %921 = vmatpush.bf16.msra.mxu1 %v2110_v19 }
 0x127   :  { %982 = vmatpush.bf16.msra.mxu3 %v2125_v21 }
 0x128   :  { %359 = vrot.lane.b32.xlu2 %v354_v47, %s1779_s17  ;;  %v445_v48 = vpop.f32.mrf.mxu3 }
 0x129   :  { %v450_v51 = vpack.c.bf16 %v445_v48, %v445_v48  ;;  %922 = vmatpush.bf16.msra.mxu1 %v2125_v21 }
 0x12b   :  { %v535_v49 = vpop.f32.mrf.mxu1  ;;  %983 = vmatpush.bf16.msra.mxu3 %v2136_v27 }
 0x12c   :  { %v540_v50 = vpack.c.bf16 %v535_v49, %v535_v49 }
 0x12d   :  { %923 = vmatpush.bf16.msra.mxu1 %v2136_v27 }
 0x12e   :  { %544 = vrot.lane.b32.xlu0 %v540_v50, %s1780_s18 }
 0x12f   :  { %984 = vmatpush.bf16.msra.mxu3 %v2151_v23 }
 0x130   :  { %454 = vrot.lane.b32.xlu2 %v450_v51, %s1781_s19  ;;  %v447_v52 = vpop.f32.mrf.mxu3 }
 0x131   :  { %v451_v54 = vpack.c.bf16 %v447_v52, %v447_v52  ;;  %924 = vmatpush.bf16.msra.mxu1 %v2151_v23 }
 0x133   :  { %v537_v53 = vpop.f32.mrf.mxu1  ;;  %985 = vmatpush.bf16.msra.mxu3 %v2162_v31 }
 0x134   :  { %v541_v55 = vpack.c.bf16 %v537_v53, %v537_v53  ;;  %v490_v56 = vpop.f32.mrf.mxu0 }
 0x135   :  { %v495_v58 = vpack.c.bf16 %v490_v56, %v490_v56  ;;  %925 = vmatpush.bf16.msra.mxu1 %v2162_v31 }
 0x136   :  { %456 = vrot.lane.b32.xlu0 %v451_v54, %s1781_s19  ;;  %546 = vrot.lane.b32.xlu1 %v541_v55, %s1780_s18  ;;  %s1794_s18 = smov 32  }
 0x138   :  { %v632_v57 = vpop.f32.mrf.mxu3 }
 0x139   :  { %v637_v59 = vpack.c.bf16 %v632_v57, %v632_v57 }
 0x13c   :  { %v492_v60 = vpop.f32.mrf.mxu0 }
 0x13d   :  { %v496_v61 = vpack.c.bf16 %v492_v60, %v492_v60 }
 0x13e   :  { %499 = vrot.lane.b32.xlu1 %v495_v58, %s1782_s20  ;;  %641 = vrot.lane.b32.xlu0 %v637_v59, %s1783_s21 }
 0x13f   :  { %501 = vrot.lane.b32.xlu2 %v496_v61, %s1782_s20  ;;  %s1796_s20 = smov [#allocation3]  }
 0x140   :  { %v634_v62 = vpop.f32.mrf.mxu3 }
 0x141   :  { %v638_v63 = vpack.c.bf16 %v634_v62, %v634_v62 }
 0x143   :  { %v587_v0 = vpop.f32.mrf.mxu2 }
 0x144   :  { %v592_v1 = vpack.c.bf16 %v587_v0, %v587_v0 }
 0x146   :  { %643 = vrot.lane.b32.xlu1 %v638_v63, %s1783_s21  ;;  %s1411_s21 = sshll.u32 %s1796_s20, 4  ;;  %s1412_s21 = int_to_ptr.vmem [resolvable:$true] %s1411_s21 }
 0x147   :  { %596 = vrot.lane.b32.xlu2 %v592_v1, %s1784_s22 }
 0x14b   :  { %v589_v4 = vpop.f32.mrf.mxu2 }
 0x14c   :  { %v593_v5 = vpack.c.bf16 %v589_v4, %v589_v4 }
 0x14e   :  { %598 = vrot.lane.b32.xlu0 %v593_v5, %s1784_s22  ;;  %v2094_v16 = vpop.permute.xlu2 %165 }
 0x14f   :  { %v168_v33 = vrot.slane %v2094_v16, 4 }
 0x151   :  { %v171_v37 = vsel %vm169_vm15, %v168_v33, %v2094_v16 }
 0x15e   :  { %v164_v25 = vpop.permute.xlu1 %163 }
 0x15f   :  { %v167_v26 = vrot.slane %v164_v25, 4 }
 0x161   :  { %v170_v22 = vsel %vm169_vm15, %v167_v26, %v164_v25  ;;  %vm505_vm15 = vcmask 945680  }
 0x16a   :  { %v218_v24 = vpop.permute.xlu2 %217 }
 0x172   :  { %v306_v30 = vpop.permute.xlu2 %305 }
 0x173   :  { %v119_v29 = vpop.permute.xlu0 %118  ;;  %v309_v35 = vrot.slane %v306_v30, 4 }
 0x174   :  { %125 = vst.msk [vmem:[#allocation2] sm:$0xf] %vm124_vm13, %v119_v29 }
 0x175   :  { %177 = vst.msk [vmem:[#allocation2] sm:$0xff] %vm2140_vm14, %v170_v22  ;;  %v312_v40 = vsel %vm311_vm4, %v309_v35, %v306_v30 }
 0x17a   :  { %v216_v32 = vpop.permute.xlu1 %215  ;;  %v403_v34 = vpop.permute.xlu2 %402 }
 0x17b   :  { %222 = vst.msk [vmem:[#allocation2 + $0x4] sm:$0xf] %vm221_vm0, %v216_v32  ;;  %v406_v51 = vrot.slane %v403_v34, 4 }
 0x17c   :  { %v1560_v41 = vld [vmem:[#allocation2] sm:$0xf] }
 0x17d   :  { %v1487_v45 = vld [vmem:[#allocation2] sm:$0xf]  ;;  %v409_v55 = vsel %vm408_vm2, %v406_v51, %v403_v34 }
 0x182   :  { %v121_v36 = vpop.permute.xlu1 %120  ;;  %v360_v42 = vpop.permute.xlu2 %359 }
 0x183   :  { %126 = vst.msk [vmem:[#allocation2 + $0x18] sm:$0xf] %vm124_vm13, %v121_v36  ;;  %v261_v38 = vpop.permute.xlu0 %260  ;;  %vm555_vm13 = vcmask 1044384  }
 0x184   :  { %178 = vst.msk [vmem:[#allocation2 + $0x18] sm:$0xff] %vm2140_vm14, %v171_v37  ;;  %vm556_vm14 = vcmask 310276  }
 0x185   :  { %223 = vst.msk [vmem:[#allocation2 + $0x1c] sm:$0xf] %vm221_vm0, %v218_v24  ;;  %vm2250_vm0 = vmor %vm556_vm14, %vm555_vm13  ;;  %vm1103_vm13 = vcmask 687104   ;;  %vm1146_vm14 = vcmask 277504  }
 0x186   :  { %267 = vst.msk [vmem:[#allocation2 + $0x4] sm:$0xf] %vm266_vm5, %v261_v38 }
 0x187   :  { %319 = vst.msk [vmem:[#allocation2 + $0x4] sm:$0xff] %vm2183_vm6, %v312_v40 }
 0x18a   :  { %v263_v43 = vpop.permute.xlu1 %262  ;;  %v455_v56 = vpop.permute.xlu2 %454 }
 0x18b   :  { %v1651_v44 = vld [vmem:[#allocation2 + $0x14] sm:$0xf0]  ;;  %268 = vst.msk [vmem:[#allocation2 + $0x1c] sm:$0xf] %vm266_vm5, %v263_v43  ;;  %vm653_vm5 = vcmask 80900  }
 0x18c   :  { %v1649_v46 = vld [vmem:[#allocation2 + $0x14] sm:$0xf0]  ;;  %v2201_v47 = vor.u32 %v1651_v44, %v1560_v41  ;;  %vm2265_vm8 = vmor %vm653_vm5, %vm652_vm3 }
 0x18d   :  { %v1488_v48 = vor.u32 %v1649_v46, %v1487_v45  ;;  %v308_v49 = vpop.permute.xlu0 %307 }
 0x18e   :  { %848 = vrot.lane.b32.xlu1 %v2201_v47, %s1785_s2  ;;  %v310_v50 = vrot.slane %v308_v49, 4  ;;  %v1574_v59 = vld [vmem:[#allocation2 + $0x4] sm:$0xf] }
 0x18f   :  { %811 = vmatmul.bf16.vlgmr.msrb.gmra.mxu0 %v1488_v48  ;;  %v1650_v60 = vld [vmem:[#allocation2 + $0x4] sm:$0xf] }
 0x190   :  { %1007 = vmatpush.bf16.msrb.mxu0 %v2036_v3  ;;  %v313_v52 = vsel %vm311_vm4, %v310_v50, %v308_v49  ;;  %v1648_v61 = vld [vmem:[#allocation2 + $0x4] sm:$0xf] }
 0x191   :  { %320 = vst.msk [vmem:[#allocation2 + $0x1c] sm:$0xff] %vm2183_vm6, %v313_v52  ;;  %vm602_vm6 = vcmask 716080  }
 0x192   :  { %v358_v54 = vpop.permute.xlu1 %357  ;;  %365 = vst.msk [vmem:[#allocation2 + $0x20] sm:$0xf] %vm363_vm9, %v360_v42 }
 0x193   :  { %364 = vst.msk [vmem:[#allocation2 + $0x8] sm:$0xf] %vm363_vm9, %v358_v54  ;;  %vm854_vm9 = vcmask 637952  }
 0x194   :  { %1008 = vmatpush.bf16.msrb.mxu0 %v2043_v6  ;;  %416 = vst.msk [vmem:[#allocation2 + $0x8] sm:$0xff] %vm2213_vm10, %v409_v55 }
 0x195   :  { %v405_v57 = vpop.permute.xlu0 %404  ;;  %461 = vst.msk [vmem:[#allocation2 + $0xc] sm:$0xf] %vm460_vm11, %v455_v56 }
 0x196   :  { %v407_v58 = vrot.slane %v405_v57, 4 }
 0x198   :  { %1009 = vmatpush.bf16.msrb.mxu0 %v2052_v7  ;;  %v410_v62 = vsel %vm408_vm2, %v407_v58, %v405_v57  ;;  %v1654_v63 = vld [vmem:[#allocation2 + $0x18] sm:$0xf0]  ;;  %vm957_vm2 = vcmask 867328  }
 0x199   :  { %v1562_v0 = vld [vmem:[#allocation2 + $0x18] sm:$0xf0]  ;;  %417 = vst.msk [vmem:[#allocation2 + $0x20] sm:$0xff] %vm2213_vm10, %v410_v62  ;;  %v1575_v4 = vor.u32 %v1654_v63, %v1574_v59  ;;  %v502_v2 = vpop.permute.xlu2 %501  ;;  %vm897_vm10 = vcmask 228352  }
 0x19a   :  { %v1489_v1 = vld [vmem:[#allocation2 + $0x18] sm:$0xf0]  ;;  %v1565_v5 = vor.u32 %v1650_v60, %v1562_v0 }
 0x19b   :  { %v1492_v9 = vor.u32 %v1648_v61, %v1489_v1  ;;  %951 = vrot.lane.b32.xlu1 %v1575_v4, %s1786_s30  ;;  %v1653_v10 = vld [vmem:[#allocation2 + $0x8] sm:$0xf] }
 0x19c   :  { %1010 = vmatpush.bf16.msrb.mxu0 %v2059_v8  ;;  %850 = vrot.lane.b32.xlu2 %v1565_v5, %s1785_s2  ;;  %v1568_v24 = vld [vmem:[#allocation2 + $0x8] sm:$0xf] }
 0x19d   :  { %1557 = vmatmul.msk.bf16.vlgmr.msrb.gmra.mxu1 %vm311_vm4, %v1492_v9  ;;  %v1589_v43 = vld [vmem:[#allocation2 + $0x8] sm:$0xf] }
 0x19e   :  { %1021 = vmatpush.bf16.msrb.mxu1 %v2069_v12 }
 0x1a0   :  { %1011 = vmatpush.bf16.msrb.mxu0 %v2075_v13  ;;  %v545_v11 = vpop.permute.xlu0 %544  ;;  %v1576_v16 = vld [vmem:[#allocation2 + $0x1c] sm:$0xf0] }
 0x1a1   :  { %v1652_v25 = vld [vmem:[#allocation2 + $0x1c] sm:$0xf0]  ;;  %v1579_v26 = vor.u32 %v1653_v10, %v1576_v16  ;;  %v548_v34 = vrot.slane %v545_v11, 4  ;;  %v597_v35 = vpop.permute.xlu2 %596 }
 0x1a2   :  { %v2238_v28 = vor.u32 %v1652_v25, %v1568_v24  ;;  %1022 = vmatpush.bf16.msrb.mxu1 %v2080_v14  ;;  %v1657_v42 = vld [vmem:[#allocation2 + $0x1c] sm:$0xf0] }
 0x1a3   :  { %891 = vrot.lane.b32.xlu1 %v2201_v47, %s1787_s7  ;;  %v551_v38 = vsel %vm550_vm1, %v548_v34, %v545_v11  ;;  %v1590_v45 = vor.u32 %v1657_v42, %v1589_v43 }
 0x1a4   :  { %1012 = vmatpush.bf16.msrb.mxu0 %v2089_v15  ;;  %953 = vrot.lane.b32.xlu2 %v1579_v26, %s1786_s30 }
 0x1a5   :  { %852 = vrot.lane.b32.xlu0 %v2238_v28, %s1785_s2 }
 0x1a6   :  { %1023 = vmatpush.bf16.msrb.mxu1 %v2099_v17 }
 0x1a8   :  { %1013 = vmatpush.bf16.msrb.mxu0 %v2105_v18  ;;  %v457_v29 = vpop.permute.xlu0 %456  ;;  %v547_v22 = vpop.permute.xlu1 %546 }
 0x1a9   :  { %462 = vst.msk [vmem:[#allocation2 + $0x24] sm:$0xf] %vm460_vm11, %v457_v29  ;;  %v549_v32 = vrot.slane %v547_v22, 4  ;;  %vm1043_vm11 = vcmask 48128  }
 0x1aa   :  { %1024 = vmatpush.bf16.msrb.mxu1 %v2110_v19  ;;  %507 = vst.msk [vmem:[#allocation2 + $0x24] sm:$0xf] %vm505_vm15, %v502_v2 }
 0x1ab   :  { %v552_v33 = vsel %vm550_vm1, %v549_v32, %v547_v22  ;;  %1037 = vrot.lane.b32.xlu1 %v1575_v4, %s1788_s8 }
 0x1ac   :  { %1014 = vmatpush.bf16.msrb.mxu0 %v2118_v20  ;;  %893 = vrot.lane.b32.xlu2 %v1565_v5, %s1787_s7  ;;  %559 = vst.msk [vmem:[#allocation2 + $0x24] sm:$0xff] %vm2250_vm0, %v552_v33 }
 0x1ae   :  { %1025 = vmatpush.bf16.msrb.mxu1 %v2125_v21 }
 0x1b0   :  { %v500_v36 = vpop.permute.xlu1 %499  ;;  %v642_v37 = vpop.permute.xlu0 %641 }
 0x1b1   :  { %506 = vst.msk [vmem:[#allocation2 + $0xc] sm:$0xf] %vm505_vm15, %v500_v36  ;;  %v645_v40 = vrot.slane %v642_v37, 4  ;;  %vm1206_vm15 = vcmask 916480  }
 0x1b2   :  { %1026 = vmatpush.bf16.msrb.mxu1 %v2136_v27  ;;  %558 = vst.msk [vmem:[#allocation2 + $0xc] sm:$0xff] %vm2250_vm0, %v551_v38  ;;  %vm1249_vm0 = vcmask 506880  }
 0x1b3   :  { %994 = vrot.lane.b32.xlu1 %v1575_v4, %s1789_s9  ;;  %603 = vst.msk [vmem:[#allocation2 + $0x10] sm:$0xf] %vm602_vm6, %v597_v35  ;;  %v648_v41 = vsel %vm647_vm7, %v645_v40, %v642_v37  ;;  %v1655_v47 = vld [vmem:[#allocation2 + $0x20] sm:$0xf0] }
 0x1b4   :  { %1039 = vrot.lane.b32.xlu2 %v1579_v26, %s1788_s8  ;;  %655 = vst.msk [vmem:[#allocation2 + $0x10] sm:$0xff] %vm2265_vm8, %v648_v41  ;;  %v1591_v52 = vld [vmem:[#allocation2 + $0x20] sm:$0xf0] }
 0x1b5   :  { %v1660_v56 = vld [vmem:[#allocation2 + $0x20] sm:$0xf0] }
 0x1b6   :  { %1027 = vmatpush.bf16.msrb.mxu1 %v2151_v23 }
 0x1b8   :  { %v644_v44 = vpop.permute.xlu1 %643 }
 0x1b9   :  { %v1582_v46 = vld [vmem:[#allocation2 + $0xc] sm:$0xf]  ;;  %v646_v49 = vrot.slane %v644_v44, 4 }
 0x1ba   :  { %1028 = vmatpush.bf16.msrb.mxu1 %v2162_v31  ;;  %v1583_v48 = vor.u32 %v1655_v47, %v1582_v46  ;;  %v1656_v50 = vld [vmem:[#allocation2 + $0xc] sm:$0xf] }
 0x1bb   :  { %1140 = vrot.lane.b32.xlu1 %v1590_v45, %s1790_s10  ;;  %v649_v51 = vsel %vm647_vm7, %v646_v49, %v644_v44  ;;  %v1594_v54 = vor.u32 %v1656_v50, %v1591_v52  ;;  %v1603_v55 = vld [vmem:[#allocation2 + $0xc] sm:$0xf]  ;;  %v1659_v58 = vld [vmem:[#allocation2 + $0x10] sm:$0xf]  ;;  %v1611_v0 = vld [vmem:[#allocation2 + $0x14] sm:$0xf] }
 0x1bc   :  { %996 = vrot.lane.b32.xlu2 %v1579_v26, %s1789_s9  ;;  %955 = vrot.lane.b32.xlu0 %v1583_v48, %s1786_s30  ;;  %v1604_v57 = vor.u32 %v1660_v56, %v1603_v55  ;;  %v1597_v61 = vld [vmem:[#allocation2 + $0x10] sm:$0xf] }
 0x1c0   :  { %v599_v53 = vpop.permute.xlu0 %598 }
 0x1c1   :  { %604 = vst.msk [vmem:[#allocation2 + $0x28] sm:$0xf] %vm602_vm6, %v599_v53 }
 0x1c2   :  { %656 = vst.msk [vmem:[#allocation2 + $0x28] sm:$0xff] %vm2265_vm8, %v649_v51 }
 0x1c3   :  { %1097 = vrot.lane.b32.xlu1 %v1590_v45, %s1791_s11 }
 0x1c4   :  { %1142 = vrot.lane.b32.xlu2 %v1594_v54, %s1790_s10  ;;  %895 = vrot.lane.b32.xlu0 %v2238_v28, %s1787_s7 }
 0x1c9   :  { %v1605_v59 = vld [vmem:[#allocation2 + $0x24] sm:$0xf0]  ;;  %v1661_v1 = vld [vmem:[#allocation2 + $0x28] sm:$0xf0] }
 0x1ca   :  { %v1608_v60 = vor.u32 %v1659_v58, %v1605_v59  ;;  %v1658_v62 = vld [vmem:[#allocation2 + $0x24] sm:$0xf0]  ;;  %v1612_v4 = vor.u32 %v1661_v1, %v1611_v0 }
 0x1cb   :  { %1243 = vrot.lane.b32.xlu1 %v1604_v57, %s1792_s1  ;;  %v1598_v63 = vor.u32 %v1658_v62, %v1597_v61 }
 0x1cc   :  { %1099 = vrot.lane.b32.xlu2 %v1594_v54, %s1791_s11  ;;  %1041 = vrot.lane.b32.xlu0 %v1583_v48, %s1788_s8 }
 0x1d3   :  { %1200 = vrot.lane.b32.xlu1 %v1604_v57, %s1793_s12 }
 0x1d4   :  { %1245 = vrot.lane.b32.xlu2 %v1608_v60, %s1792_s1  ;;  %998 = vrot.lane.b32.xlu0 %v1583_v48, %s1789_s9 }
 0x1dc   :  { %1202 = vrot.lane.b32.xlu2 %v1608_v60, %s1793_s12  ;;  %1144 = vrot.lane.b32.xlu0 %v1598_v63, %s1790_s10 }
 0x1e4   :  { %1101 = vrot.lane.b32.xlu0 %v1598_v63, %s1791_s11 }
 0x1ec   :  { %1247 = vrot.lane.b32.xlu0 %v1612_v4, %s1792_s1 }
 0x1f4   :  { %1204 = vrot.lane.b32.xlu0 %v1612_v4, %s1793_s12 }
 0x1f6   :  { %v851_v5 = vpop.permute.xlu2 %850 }
 0x1fe   :  { %v954_v11 = vpop.permute.xlu2 %953 }
 0x200   :  { %v849_v9 = vpop.permute.xlu1 %848 }
 0x201   :  { %v855_v10 = vsel %vm854_vm9, %v849_v9, %v851_v5 }
 0x202   :  { %869 = vmatmul.bf16.vlgmr.msrb.gmra.mxu2 %v855_v10 }
 0x203   :  { %1050 = vmatpush.bf16.msrb.mxu2 %v2036_v3 }
 0x206   :  { %v894_v16 = vpop.permute.xlu2 %893 }
 0x207   :  { %1051 = vmatpush.bf16.msrb.mxu2 %v2043_v6 }
 0x20b   :  { %1052 = vmatpush.bf16.msrb.mxu2 %v2052_v7 }
 0x20d   :  { %v952_v24 = vpop.permute.xlu1 %951 }
 0x20e   :  { %v958_v25 = vsel %vm957_vm2, %v952_v24, %v954_v11  ;;  %v2302_v29 = vpop.permute.xlu2 %1039 }
 0x20f   :  { %1053 = vmatpush.bf16.msrb.mxu2 %v2059_v8 }
 0x212   :  { %972 = vmatmul.bf16.vlgmr.msra.gmra.mxu2 %v958_v25 }
 0x213   :  { %1054 = vmatpush.bf16.msrb.mxu2 %v2075_v13 }
 0x215   :  { %v892_v26 = vpop.permute.xlu1 %891 }
 0x216   :  { %v898_v2 = vsel %vm897_vm10, %v892_v26, %v894_v16  ;;  %v2316_v33 = vpop.permute.xlu2 %996 }
 0x217   :  { %v853_v28 = vpop.permute.xlu0 %852  ;;  %1055 = vmatpush.bf16.msrb.mxu2 %v2089_v15  ;;  %912 = vmatmul.bf16.vlgmr.msra.gmra.mxu0 %v898_v2 }
 0x218   :  { %v856_v22 = vsel %vm854_vm9, %v851_v5, %v853_v28  ;;  %1110 = vmatpush.bf16.msra.mxu0 %v2036_v3 }
 0x219   :  { %1570 = vmatmul.msk.bf16.vlgmr.msrb.gmra.mxu3 %vm311_vm4, %v856_v22 }
 0x21a   :  { %1064 = vmatpush.bf16.msrb.mxu3 %v2069_v12 }
 0x21b   :  { %1056 = vmatpush.bf16.msrb.mxu2 %v2105_v18 }
 0x21c   :  { %1111 = vmatpush.bf16.msra.mxu0 %v2043_v6 }
 0x21d   :  { %v1038_v30 = vpop.permute.xlu1 %1037 }
 0x21e   :  { %1065 = vmatpush.bf16.msrb.mxu3 %v2080_v14  ;;  %v1044_v32 = vsel %vm1043_vm11, %v1038_v30, %v2302_v29  ;;  %v2327_v36 = vpop.permute.xlu2 %1142 }
 0x21f   :  { %1057 = vmatpush.bf16.msrb.mxu2 %v2118_v20 }
 0x220   :  { %1112 = vmatpush.bf16.msra.mxu0 %v2052_v7 }
 0x222   :  { %1066 = vmatpush.bf16.msrb.mxu3 %v2099_v17  ;;  %1058 = vmatmul.bf16.vlgmr.msrb.gmra.mxu2 %v1044_v32 }
 0x223   :  { %1153 = vmatpush.bf16.msra.mxu2 %v2036_v3 }
 0x224   :  { %1113 = vmatpush.bf16.msra.mxu0 %v2059_v8 }
 0x225   :  { %v995_v34 = vpop.permute.xlu1 %994 }
 0x226   :  { %1067 = vmatpush.bf16.msrb.mxu3 %v2110_v19  ;;  %v1001_v35 = vsel %vm1000_vm12, %v995_v34, %v2316_v33  ;;  %v2339_v40 = vpop.permute.xlu2 %1099  ;;  %v1662_v34 = vld [vmem:[%s2438_s4] sm:$0xff] }
 0x227   :  { %1154 = vmatpush.bf16.msra.mxu2 %v2043_v6  ;;  %1015 = vmatmul.bf16.vlgmr.msrb.gmra.mxu0 %v1001_v35 }
 0x228   :  { %1114 = vmatpush.bf16.msra.mxu0 %v2075_v13 }
 0x22a   :  { %1068 = vmatpush.bf16.msrb.mxu3 %v2125_v21 }
 0x22b   :  { %1155 = vmatpush.bf16.msra.mxu2 %v2052_v7 }
 0x22c   :  { %1115 = vmatpush.bf16.msra.mxu0 %v2089_v15 }
 0x22d   :  { %v1141_v37 = vpop.permute.xlu1 %1140 }
 0x22e   :  { %1069 = vmatpush.bf16.msrb.mxu3 %v2136_v27  ;;  %v956_v38 = vpop.permute.xlu0 %955  ;;  %v1147_v45 = vsel %vm1146_vm14, %v1141_v37, %v2327_v36  ;;  %v1246_v49 = vpop.permute.xlu2 %1245 }
 0x22f   :  { %1156 = vmatpush.bf16.msra.mxu2 %v2059_v8  ;;  %v959_v39 = vsel %vm957_vm2, %v954_v11, %v956_v38  ;;  %v1663_v11 = vld [vmem:[%s2438_s4 + $0x8] sm:$0xff] }
 0x230   :  { %1116 = vmatpush.bf16.msra.mxu0 %v2105_v18  ;;  %1584 = vmatmul.msk.bf16.vlgmr.msra.gmra.mxu3 %vm311_vm4, %v959_v39 }
 0x232   :  { %1070 = vmatpush.bf16.msrb.mxu3 %v2151_v23 }
 0x233   :  { %1157 = vmatpush.bf16.msra.mxu2 %v2075_v13 }
 0x234   :  { %1117 = vmatpush.bf16.msra.mxu0 %v2118_v20 }
 0x235   :  { %v1098_v41 = vpop.permute.xlu1 %1097 }
 0x236   :  { %1071 = vmatpush.bf16.msrb.mxu3 %v2162_v31  ;;  %v1104_v42 = vsel %vm1103_vm13, %v1098_v41, %v2339_v40  ;;  %v896_v43 = vpop.permute.xlu0 %895 }
 0x237   :  { %1158 = vmatpush.bf16.msra.mxu2 %v2089_v15  ;;  %v899_v44 = vsel %vm897_vm10, %v894_v16, %v896_v43  ;;  %1118 = vmatmul.bf16.vlgmr.msra.gmra.mxu0 %v1104_v42 }
 0x238   :  { %1213 = vmatpush.bf16.msrb.mxu0 %v2036_v3  ;;  %1571 = vmatmul.msk.bf16.vlgmr.msra.gmra.mxu1 %vm311_vm4, %v899_v44 }
 0x239   :  { %1124 = vmatpush.bf16.msra.mxu1 %v2069_v12 }
 0x23a   :  { %1167 = vmatpush.bf16.msra.mxu3 %v2069_v12 }
 0x23b   :  { %1159 = vmatpush.bf16.msra.mxu2 %v2105_v18 }
 0x23c   :  { %1214 = vmatpush.bf16.msrb.mxu0 %v2043_v6 }
 0x23d   :  { %1125 = vmatpush.bf16.msra.mxu1 %v2080_v14 }
 0x23e   :  { %1168 = vmatpush.bf16.msra.mxu3 %v2080_v14  ;;  %v1042_v46 = vpop.permute.xlu0 %1041 }
 0x23f   :  { %1160 = vmatpush.bf16.msra.mxu2 %v2118_v20  ;;  %v1045_v47 = vsel %vm1043_vm11, %v2302_v29, %v1042_v46 }
 0x240   :  { %1215 = vmatpush.bf16.msrb.mxu0 %v2052_v7  ;;  %1586 = vmatmul.msk.bf16.vlgmr.msrb.gmra.mxu3 %vm311_vm4, %v1045_v47 }
 0x241   :  { %1126 = vmatpush.bf16.msra.mxu1 %v2099_v17 }
 0x242   :  { %1169 = vmatpush.bf16.msra.mxu3 %v2099_v17  ;;  %1161 = vmatmul.bf16.vlgmr.msra.gmra.mxu2 %v1147_v45 }
 0x243   :  { %1256 = vmatpush.bf16.msrb.mxu2 %v2036_v3  ;;  %v1244_v3 = vpop.permute.xlu1 %1243 }
 0x244   :  { %1216 = vmatpush.bf16.msrb.mxu0 %v2059_v8  ;;  %v1250_v53 = vsel %vm1249_vm0, %v1244_v3, %v1246_v49 }
 0x245   :  { %1127 = vmatpush.bf16.msra.mxu1 %v2110_v19 }
 0x246   :  { %1170 = vmatpush.bf16.msra.mxu3 %v2110_v19  ;;  %v999_v48 = vpop.permute.xlu0 %998 }
 0x247   :  { %1257 = vmatpush.bf16.msrb.mxu2 %v2043_v6  ;;  %v1002_v6 = vsel %vm1000_vm12, %v2316_v33, %v999_v48 }
 0x248   :  { %1217 = vmatpush.bf16.msrb.mxu0 %v2075_v13  ;;  %1585 = vmatmul.msk.bf16.vlgmr.msrb.gmra.mxu1 %vm311_vm4, %v1002_v6 }
 0x249   :  { %1128 = vmatpush.bf16.msra.mxu1 %v2125_v21 }
 0x24a   :  { %1171 = vmatpush.bf16.msra.mxu3 %v2125_v21 }
 0x24b   :  { %1258 = vmatpush.bf16.msrb.mxu2 %v2052_v7  ;;  %v1201_v50 = vpop.permute.xlu1 %1200 }
 0x24c   :  { %1218 = vmatpush.bf16.msrb.mxu0 %v2089_v15 }
 0x24d   :  { %1129 = vmatpush.bf16.msra.mxu1 %v2136_v27 }
 0x24e   :  { %1172 = vmatpush.bf16.msra.mxu3 %v2136_v27  ;;  %v1145_v7 = vpop.permute.xlu0 %1144 }
 0x24f   :  { %1259 = vmatpush.bf16.msrb.mxu2 %v2059_v8  ;;  %v1203_v8 = vpop.permute.xlu2 %1202  ;;  %v1148_v51 = vsel %vm1146_vm14, %v2327_v36, %v1145_v7 }
 0x250   :  { %1219 = vmatpush.bf16.msrb.mxu0 %v2105_v18 }
 0x251   :  { %1130 = vmatpush.bf16.msra.mxu1 %v2151_v23 }
 0x252   :  { %1173 = vmatpush.bf16.msra.mxu3 %v2151_v23 }
 0x253   :  { %1260 = vmatpush.bf16.msrb.mxu2 %v2075_v13  ;;  %v1207_v13 = vsel %vm1206_vm15, %v1201_v50, %v1203_v8 }
 0x254   :  { %1220 = vmatpush.bf16.msrb.mxu0 %v2118_v20 }
 0x255   :  { %1131 = vmatpush.bf16.msra.mxu1 %v2162_v31 }
 0x256   :  { %1174 = vmatpush.bf16.msra.mxu3 %v2162_v31 }
 0x257   :  { %1261 = vmatpush.bf16.msrb.mxu2 %v2089_v15  ;;  %1221 = vmatmul.bf16.vlgmr.msrb.gmra.mxu0 %v1207_v13  ;;  %v1102_v15 = vpop.permute.xlu0 %1101 }
 0x258   :  { %v1105_v52 = vsel %vm1103_vm13, %v2339_v40, %v1102_v15  ;;  %1325 = vmatpush.bf16.msra.mxu0 %v1663_v11  ;;  %v1725_v11 = vld [vmem:[%s2439_s5] ss:$0 sm:$0xff]  ;;  %s1795_s5 = smov 96  }
 0x259   :  { %1600 = vmatmul.msk.bf16.vlgmr.msra.gmra.mxu3 %vm311_vm4, %v1148_v51  ;;  %1227 = vmatpush.bf16.msrb.mxu1 %v2069_v12 }
 0x25a   :  { %1270 = vmatpush.bf16.msrb.mxu3 %v2069_v12  ;;  %1599 = vmatmul.msk.bf16.vlgmr.msra.gmra.mxu1 %vm311_vm4, %v1105_v52 }
 0x25b   :  { %1262 = vmatpush.bf16.msrb.mxu2 %v2105_v18 }
 0x25c   :  { %1326 = vmatpush.bf16.msra.mxu0 %v1662_v34 }
 0x25d   :  { %1228 = vmatpush.bf16.msrb.mxu1 %v2080_v14 }
 0x25e   :  { %1271 = vmatpush.bf16.msrb.mxu3 %v2080_v14 }
 0x25f   :  { %1263 = vmatpush.bf16.msrb.mxu2 %v2118_v20  ;;  %v1248_v12 = vpop.permute.xlu0 %1247  ;;  %v826_v20 = vpop.f32.mrf.mxu1 }
 0x260   :  { %v1251_v14 = vsel %vm1249_vm0, %v1246_v49, %v1248_v12 }
 0x261   :  { %1229 = vmatpush.bf16.msrb.mxu1 %v2099_v17 }
 0x262   :  { %1272 = vmatpush.bf16.msrb.mxu3 %v2099_v17  ;;  %1264 = vmatmul.bf16.vlgmr.msrb.gmra.mxu2 %v1250_v53 }
 0x265   :  { %1230 = vmatpush.bf16.msrb.mxu1 %v2110_v19 }
 0x266   :  { %1273 = vmatpush.bf16.msrb.mxu3 %v2110_v19  ;;  %v812_v19 = vpop.f32.mrf.mxu0 }
 0x267   :  { %v1205_v17 = vpop.permute.xlu0 %1204  ;;  %v828_v55 = vpop.f32.mrf.mxu1  ;;  %v827_v28 = vadd.f32 %v826_v20, %v812_v19 }
 0x268   :  { %v1208_v18 = vsel %vm1206_vm15, %v1203_v8, %v1205_v17 }
 0x269   :  { %1231 = vmatpush.bf16.msrb.mxu1 %v2125_v21 }
 0x26a   :  { %1274 = vmatpush.bf16.msrb.mxu3 %v2125_v21 }
 0x26d   :  { %1232 = vmatpush.bf16.msrb.mxu1 %v2136_v27 }
 0x26e   :  { %1275 = vmatpush.bf16.msrb.mxu3 %v2136_v27  ;;  %v814_v54 = vpop.f32.mrf.mxu0 }
 0x26f   :  { %v829_v38 = vadd.f32 %v828_v55, %v814_v54  ;;  %v1724_v54 = vld [vmem:[%s2437_s3] ss:$0 sm:$0xff] }
 0x271   :  { %1233 = vmatpush.bf16.msrb.mxu1 %v2151_v23 }
 0x272   :  { %1276 = vmatpush.bf16.msrb.mxu3 %v2151_v23 }
 0x275   :  { %1234 = vmatpush.bf16.msrb.mxu1 %v2162_v31 }
 0x276   :  { %1277 = vmatpush.bf16.msrb.mxu3 %v2162_v31 }
 0x278   :  { %1613 = vmatmul.msk.bf16.vlgmr.msrb.gmra.mxu1 %vm311_vm4, %v1208_v18 }
 0x279   :  { %1614 = vmatmul.msk.bf16.vlgmr.msrb.gmra.mxu3 %vm311_vm4, %v1251_v14  ;;  %vm1315_vm4 = vcmask 261120  }
 0x285   :  { %v870_v21 = vpop.f32.mrf.mxu2 }
 0x28d   :  { %v872_v23 = vpop.f32.mrf.mxu2 }
 0x294   :  { %v913_v57 = vpop.f32.mrf.mxu0 }
 0x295   :  { %v973_v59 = vpop.f32.mrf.mxu2 }
 0x29c   :  { %v884_v27 = vpop.f32.mrf.mxu3  ;;  %v915_v61 = vpop.f32.mrf.mxu0 }
 0x29d   :  { %v975_v63 = vpop.f32.mrf.mxu2  ;;  %v885_v25 = vadd.f32 %v884_v27, %v870_v21 }
 0x29f   :  { %v889_v22 = vmax.f32 %v827_v28, %v885_v25 }
 0x2a4   :  { %v886_v56 = vpop.f32.mrf.mxu3  ;;  %v1016_v0 = vpop.f32.mrf.mxu0 }
 0x2a5   :  { %v1059_v4 = vpop.f32.mrf.mxu2  ;;  %v887_v35 = vadd.f32 %v886_v56, %v872_v23 }
 0x2a7   :  { %v890_v42 = vmax.f32 %v829_v38, %v887_v35 }
 0x2ac   :  { %v1018_v9 = vpop.f32.mrf.mxu0 }
 0x2ad   :  { %v1061_v16 = vpop.f32.mrf.mxu2 }
 0x2b3   :  { %v987_v60 = vpop.f32.mrf.mxu3 }
 0x2b4   :  { %v1119_v26 = vpop.f32.mrf.mxu0  ;;  %v988_v36 = vadd.f32 %v987_v60, %v973_v59 }
 0x2b5   :  { %v927_v58 = vpop.f32.mrf.mxu1 }
 0x2b6   :  { %v928_v2 = vadd.f32 %v927_v58, %v913_v57 }
 0x2b8   :  { %v932_v32 = vmax.f32 %v889_v22, %v928_v2 }
 0x2ba   :  { %v992_v40 = vmax.f32 %v932_v32, %v988_v36 }
 0x2bb   :  { %v989_v31 = vpop.f32.mrf.mxu3 }
 0x2bc   :  { %v1121_v41 = vpop.f32.mrf.mxu0  ;;  %v990_v48 = vadd.f32 %v989_v31, %v975_v63 }
 0x2bd   :  { %v929_v62 = vpop.f32.mrf.mxu1 }
 0x2be   :  { %v930_v39 = vadd.f32 %v929_v62, %v915_v61 }
 0x2c0   :  { %v933_v45 = vmax.f32 %v890_v42, %v930_v39 }
 0x2c2   :  { %v993_v50 = vmax.f32 %v933_v45, %v990_v48 }
 0x2c3   :  { %v1073_v5 = vpop.f32.mrf.mxu3 }
 0x2c4   :  { %v1074_v46 = vadd.f32 %v1073_v5, %v1059_v4 }
 0x2c5   :  { %v1030_v1 = vpop.f32.mrf.mxu1  ;;  %v1162_v30 = vpop.f32.mrf.mxu2 }
 0x2c6   :  { %v1031_v37 = vadd.f32 %v1030_v1, %v1016_v0 }
 0x2c8   :  { %v1035_v43 = vmax.f32 %v992_v40, %v1031_v37 }
 0x2ca   :  { %v1078_v49 = vmax.f32 %v1035_v43, %v1074_v46 }
 0x2cb   :  { %v1075_v24 = vpop.f32.mrf.mxu3 }
 0x2cc   :  { %v1076_v53 = vadd.f32 %v1075_v24, %v1061_v16 }
 0x2cd   :  { %v1032_v10 = vpop.f32.mrf.mxu1  ;;  %v1164_v47 = vpop.f32.mrf.mxu2 }
 0x2ce   :  { %v1033_v6 = vadd.f32 %v1032_v10, %v1018_v9 }
 0x2d0   :  { %v1036_v15 = vmax.f32 %v993_v50, %v1033_v6 }
 0x2d2   :  { %v1079_v19 = vmax.f32 %v1036_v15, %v1076_v53 }
 0x2d4   :  { %v1222_v51 = vpop.f32.mrf.mxu0 }
 0x2d7   :  { %v1133_v29 = vpop.f32.mrf.mxu1 }
 0x2d8   :  { %v1134_v3 = vadd.f32 %v1133_v29, %v1119_v26 }
 0x2da   :  { %v1138_v8 = vmax.f32 %v1078_v49, %v1134_v3 }
 0x2dc   :  { %v1176_v33 = vpop.f32.mrf.mxu3  ;;  %v1224_v57 = vpop.f32.mrf.mxu0 }
 0x2dd   :  { %v1177_v13 = vadd.f32 %v1176_v33, %v1162_v30 }
 0x2df   :  { %v1135_v44 = vpop.f32.mrf.mxu1  ;;  %v1181_v12 = vmax.f32 %v1138_v8, %v1177_v13 }
 0x2e0   :  { %v1136_v14 = vadd.f32 %v1135_v44, %v1121_v41 }
 0x2e2   :  { %v1139_v55 = vmax.f32 %v1079_v19, %v1136_v14 }
 0x2e4   :  { %v1178_v7 = vpop.f32.mrf.mxu3 }
 0x2e5   :  { %v1265_v17 = vpop.f32.mrf.mxu2  ;;  %v1179_v23 = vadd.f32 %v1178_v7, %v1164_v47 }
 0x2e7   :  { %v1182_v60 = vmax.f32 %v1139_v55, %v1179_v23 }
 0x2ed   :  { %v1267_v63 = vpop.f32.mrf.mxu2 }
 0x2f5   :  { %v1236_v52 = vpop.f32.mrf.mxu1 }
 0x2f6   :  { %v1237_v18 = vadd.f32 %v1236_v52, %v1222_v51 }
 0x2f8   :  { %v1241_v20 = vmax.f32 %v1181_v12, %v1237_v18 }
 0x2fc   :  { %v1279_v21 = vpop.f32.mrf.mxu3 }
 0x2fd   :  { %v1280_v27 = vadd.f32 %v1279_v21, %v1265_v17  ;;  %v1238_v58 = vpop.f32.mrf.mxu1 }
 0x2fe   :  { %v1239_v61 = vadd.f32 %v1238_v58, %v1224_v57 }
 0x2ff   :  { %v1284_v56 = vmax.f32 %v1241_v20, %v1280_v27 }
 0x300   :  { %v1242_v31 = vmax.f32 %v1182_v60, %v1239_v61 }
 0x301   :  { %v1290_v59 = vadd.f32 %v1724_v54, %v1284_v56 }
 0x303   :  { %v1292_v62 = vmax.f32 %v1290_v59, 0.0 }
 0x304   :  { %v1281_v0 = vpop.f32.mrf.mxu3 }
 0x305   :  { %v1282_v1 = vadd.f32 %v1281_v0, %v1267_v63  ;;  %1387 = vrot.lane.b32.xlu0 %v1292_v62, %s1794_s18 }
 0x307   :  { %v1285_v4 = vmax.f32 %v1242_v31, %v1282_v1 }
 0x309   :  { %v1291_v5 = vadd.f32 %v1724_v54, %v1285_v4 }
 0x30b   :  { %v1293_v9 = vmax.f32 %v1291_v5, 0.0 }
 0x30d   :  { %v1294_v10 = vpack.c.bf16 %v1293_v9, %v1292_v62 }
 0x30f   :  { %1623 = vmatmul.msk.bf16.vlgmr.msra.gmra.mxu0 %vm1315_vm4, %v1294_v10 }
 0x377   :  { %v1388_v50 = vpop.permute.xlu0 %1387 }
 0x38c   :  { %v1328_v16 = vpop.f32.mrf.mxu0 }
 0x38d   :  { %v1329_v24 = vadd.f32 %v1725_v11, %v1328_v16 }
 0x38f   :  { %v1333_v25 = vmax.f32 %v1329_v24, 0.0  ;;  %v1624_v29 = vmul.f32 -1.442695, %v1329_v24 }
 0x391   :  { %1375 = vrot.lane.b32.xlu1 %v1333_v25, %s1794_s18  ;;  %1726 = vpow2.f32 %v1624_v29 }
 0x394   :  { %v1330_v26 = vpop.f32.mrf.mxu0 }
 0x395   :  { %v1331_v28 = vadd.f32 %v1725_v11, %v1330_v26 }
 0x397   :  { %v1334_v2 = vmax.f32 %v1331_v28, 0.0  ;;  %v1727_v22 = vpop.eup %1726  ;;  %v1625_v30 = vmul.f32 -1.442695, %v1331_v28 }
 0x398   :  { %v1341_v32 = vadd.f32 1.0, %v1727_v22 }
 0x399   :  { %1377 = vrot.lane.b32.xlu2 %v1334_v2, %s1794_s18  ;;  %1389 = vrot.lane.b32.xlu1 %v1293_v9, %s1794_s18  ;;  %1728 = vpow2.f32 %v1625_v30 }
 0x39a   :  { %1730 = vrcp.f32 %v1341_v32  ;;  %v1354_v42 = vand.u32 2147483648, %v1341_v32  ;;  %vm1348_vm3 = vweird.f32 %v1341_v32  ;;  %v1352_v44 = vand.u32 2147483647, %v1341_v32 }
 0x39c   :  { %v1355_v46 = vor.u32 1.1754944e-38, %v1354_v42  ;;  %vm1353_vm6 = vcmp.eq.f32.partialorder %v1352_v44, 8.507059e+37 }
 0x39f   :  { %v1729_v33 = vpop.eup %1728 }
 0x3a0   :  { %v1731_v34 = vpop.eup %1730  ;;  %v1342_v35 = vadd.f32 1.0, %v1729_v33 }
 0x3a1   :  { %v1344_v36 = vmul.f32 %v1731_v34, %v1341_v32  ;;  %vm1349_vm1 = vweird.f32 %v1731_v34 }
 0x3a2   :  { %1732 = vrcp.f32 %v1342_v35  ;;  %vm1350_vm5 = vmor %vm1348_vm3, %vm1349_vm1  ;;  %v1369_v49 = vand.u32 2147483648, %v1342_v35  ;;  %vm1363_vm8 = vweird.f32 %v1342_v35  ;;  %v1367_v7 = vand.u32 2147483647, %v1342_v35 }
 0x3a3   :  { %v1345_v37 = vsub.f32 1.0, %v1344_v36 }
 0x3a4   :  { %v1370_v52 = vor.u32 1.1754944e-38, %v1369_v49  ;;  %vm1368_vm2 = vcmp.eq.f32.partialorder %v1367_v7, 8.507059e+37 }
 0x3a5   :  { %v1346_v39 = vmul.f32 %v1731_v34, %v1345_v37 }
 0x3a7   :  { %v1347_v41 = vadd.f32 %v1731_v34, %v1346_v39 }
 0x3a8   :  { %v1733_v38 = vpop.eup %1732 }
 0x3a9   :  { %v1359_v40 = vmul.f32 %v1733_v38, %v1342_v35  ;;  %v1351_v45 = vsel %vm1350_vm5, %v1731_v34, %v1347_v41  ;;  %vm1364_vm7 = vweird.f32 %v1733_v38 }
 0x3aa   :  { %v1356_v3 = vsel %vm1353_vm6, %v1355_v46, %v1351_v45  ;;  %vm1365_vm9 = vmor %vm1363_vm8, %vm1364_vm7 }
 0x3ab   :  { %v1360_v43 = vsub.f32 1.0, %v1359_v40  ;;  %v1383_v6 = vsub.f32 1.0, %v1356_v3 }
 0x3ad   :  { %v1361_v47 = vmul.f32 %v1733_v38, %v1360_v43  ;;  %v1393_v51 = vmul.f32 %v1388_v50, %v1383_v6 }
 0x3af   :  { %v1362_v48 = vadd.f32 %v1733_v38, %v1361_v47 }
 0x3b1   :  { %v1366_v13 = vsel %vm1365_vm9, %v1733_v38, %v1362_v48 }
 0x3b2   :  { %v1371_v12 = vsel %vm1368_vm2, %v1370_v52, %v1366_v13 }
 0x3b3   :  { %v1384_v17 = vsub.f32 1.0, %v1371_v12 }
 0x3f3   :  { %v1378_v14 = vpop.permute.xlu2 %1377 }
 0x3f4   :  { %v1382_v19 = vmul.f32 %v1378_v14, %v1371_v12 }
 0x403   :  { %v1376_v8 = vpop.permute.xlu1 %1375 }
 0x404   :  { %v1381_v15 = vmul.f32 %v1376_v8, %v1356_v3 }
 0x406   :  { %v1395_v53 = vadd.f32 %v1393_v51, %v1381_v15 }
 0x408   :  { %1399 = vrot.lane.b32.xlu2 %v1395_v53, %s1795_s5 }
 0x40b   :  { %v1390_v18 = vpop.permute.xlu1 %1389 }
 0x40c   :  { %v1394_v20 = vmul.f32 %v1390_v18, %v1384_v17 }
 0x40e   :  { %v1396_v21 = vadd.f32 %v1394_v20, %v1382_v19 }
 0x410   :  { %1401 = vrot.lane.b32.xlu0 %v1396_v21, %s1795_s5 }
 0x462   :  { %v1400_v27 = vpop.permute.xlu2 %1399 }
 0x463   :  { %1405 = vst.msk [vmem:[#allocation3] sm:$0xff] %vm1315_vm4, %v1400_v27 }
 0x482   :  { %v1402_v54 = vpop.permute.xlu0 %1401 }
 0x483   :  { %1406 = vst.msk [vmem:[#allocation3 + $0x8] sm:$0xff] %vm1315_vm4, %v1402_v54 }
 0x484   :  { %1419 = dma.vmem_to_hbm [thread:$0]  %s1412_s21, 256, %s1414_s24, [#allocation4], %s1797_s0, %s1797_s0, %s1798_s25  }
 0x485   :  { %1758 = dma.done.wait [#allocation4], 256  }
 0x486   :  { %1759 = vsyncadd [#allocation4], 4294967040 }
 0x487   :  { %1424 = vsyncpa [#allocation4], 1 }

</bundles_post_ra>
